<compile_context>
chip_gen: v6e
topology: v6e:2x2x1
jax: 0.10.0
libtpu: 0.0.40
codegen_flags: <defaults>
</compile_context>

<pallas_src>
import functools

import jax
import jax.numpy as jnp
from jax.experimental import pallas as pl
from jax.experimental.pallas import tpu as pltpu

KERNEL_LIST = (3, 4, 5)
LEAKY_SLOPE = 0.01  # nn.LeakyReLU() default (used by the reference)


def _round_up(x, m):
    return ((x + m - 1) // m) * m


def textcnn_kernel(emb_ref, *refs, kernel_list, seq_len, emb_dim, f_pad):
    """One batch tile.

    emb_ref : (TB, L*D) bf16, lane-dense flattened embeddings.
    refs    : (w_k for k in kernel_list)  each (k*D, F_pad) bf16,
              b_all (1, nb*F_pad) f32, wfc (nb*F_pad, O_pad) f32,
              bfc (1, O_pad) f32, out (TB, O_pad) f32.
    """
    nb = len(kernel_list)
    w_refs = refs[:nb]
    b_ref, wfc_ref, bfc_ref, out_ref = refs[nb:nb + 4]
    L, D, Fp = seq_len, emb_dim, f_pad

    feats = []
    for br, k in enumerate(kernel_list):
        w = w_refs[br][...]                              # (k*D, Fp) resident
        l_out = L - k + 1
        pooled = None
        for t in range(l_out):
            # im2col window: lane-dense (TB, k*D) slice, K = k*D on the MXU.
            lhs = emb_ref[:, t * D:(t + k) * D]
            y = jnp.dot(lhs, w, preferred_element_type=jnp.float32)
            pooled = y if pooled is None else jnp.maximum(pooled, y)
        # bias + (leaky -> relu folded) activation, exact:
        #   relu(max_t(leaky(conv_t + b))) == max(max_t(conv_t) + b, 0)
        feats.append(jnp.maximum(pooled + b_ref[:, br * Fp:(br + 1) * Fp], 0.0))

    # 128-aligned lane concatenation, then a single lane-dense FC matmul.
    feat = jnp.concatenate(feats, axis=1)                # (TB, nb*Fp) f32
    logits = jnp.dot(feat, wfc_ref[...], preferred_element_type=jnp.float32)
    out_ref[...] = logits + bfc_ref[...]


def textcnn_forward(tokens, emb_table, conv_ws, conv_bs, fc_w, fc_b,
                    *, kernel_list=KERNEL_LIST, batch_tile=None):
    """tokens: (B, L) int32.  conv_ws[i]: (F, k_i, D) (PyTorch layout, in_ch
    squeezed).  conv_bs[i]: (F,).  fc_w: (O, nb*F) PyTorch layout.  fc_b: (O,)."""
    B, L = tokens.shape
    D = emb_table.shape[1]
    F = conv_ws[0].shape[0]
    O = fc_w.shape[0]
    nb = len(kernel_list)

    Fp = _round_up(F, 128)        # per-branch filter lanes (128-aligned chunks)
    Op = _round_up(O, 128)        # lane-dense logits block

    # Batch tile: multiple of 8 sublanes; big enough to amortize grid overhead,
    # split into >= 2 steps when possible so v7x's two cores both get work.
    if batch_tile is not None:
        TB = batch_tile
    else:
        TB = min(512, _round_up(B, 8))
        if B > 8 and _round_up(B, TB) // TB < 2:
            TB = max(8, _round_up((B + 1) // 2, 8))
    B_pad = _round_up(B, TB)

    # ---- wrapper-side glue (layout plumbing only) ---------------------------
    # TODO(synk): move this gather in-kernel (scalar-prefetched tokens) to
    # remove the (B_pad, L*D) HBM round trip; see header comment.
    tok = tokens if B_pad == B else jnp.pad(tokens, ((0, B_pad - B), (0, 0)))
    emb = emb_table[tok].astype(jnp.bfloat16).reshape(B_pad, L * D)

    # Per-branch im2col weights: row i*D + d, col f  <-  conv_ws[br][f, i, d];
    # columns zero-padded to Fp (padded filters stay exactly 0 downstream).
    w_packed = []
    for k, w in zip(kernel_list, conv_ws):
        w2 = jnp.transpose(w, (1, 2, 0)).reshape(k * D, F)
        w_packed.append(jnp.pad(w2, ((0, 0), (0, Fp - F))).astype(jnp.bfloat16))

    # Conv biases, one 128-aligned Fp-lane chunk per branch.
    b_all = jnp.concatenate(
        [jnp.pad(b.astype(jnp.float32), (0, Fp - F)) for b in conv_bs]
    ).reshape(1, nb * Fp)

    # FC weight laid out to match the in-kernel feature concatenation:
    # (branch br, filter f) -> row br*Fp + f; output lanes padded to Op.
    wfc = jnp.transpose(fc_w, (1, 0)).reshape(nb, F, O)
    wfc = jnp.pad(wfc, ((0, 0), (0, Fp - F), (0, Op - O)))
    wfc = wfc.reshape(nb * Fp, Op).astype(jnp.float32)
    bfc = jnp.pad(fc_b.astype(jnp.float32), (0, Op - O)).reshape(1, Op)

    resident = list(w_packed) + [b_all, wfc, bfc]

    def _resident_spec(arr):
        n = arr.ndim
        return pl.BlockSpec(arr.shape, lambda b, _n=n: (0,) * _n)

    # Explicit VMEM budget: double-buffered emb tile + out tile + resident
    # weights, plus generous headroom for f32 intermediates / compiler scratch.
    budget = (2 * TB * L * D * 2 + 2 * TB * Op * 4
              + 2 * sum(int(a.size) * a.dtype.itemsize for a in resident)
              + (8 << 20))
    vmem_limit = int(min(64 << 20, max(budget, 16 << 20)))

    kernel = functools.partial(textcnn_kernel, kernel_list=tuple(kernel_list),
                               seq_len=L, emb_dim=D, f_pad=Fp)

    out = pl.pallas_call(
        kernel,
        out_shape=jax.ShapeDtypeStruct((B_pad, Op), jnp.float32),
        grid_spec=pltpu.PrefetchScalarGridSpec(
            num_scalar_prefetch=0,
            grid=(B_pad // TB,),
            in_specs=[pl.BlockSpec((TB, L * D), lambda b: (b, 0))]
                     + [_resident_spec(a) for a in resident],
            out_specs=pl.BlockSpec((TB, Op), lambda b: (b, 0)),
        ),
        compiler_params=pltpu.CompilerParams(
            dimension_semantics=("parallel",),
            vmem_limit_bytes=vmem_limit),
    )(emb, *resident)
    return out[:B, :O]


def textcnn_reference(tokens, emb_table, conv_ws, conv_bs, fc_w, fc_b):
    """Pure-JAX reference mirroring the PyTorch forward (eval mode), using the
    same bf16 storage of the embedding / conv weights as the kernel, f32
    compute, and the original conv -> bias -> LeakyReLU -> maxpool -> relu
    order (no algebraic fold)."""
    emb = emb_table[tokens].astype(jnp.bfloat16).astype(jnp.float32)   # (B,L,D)
    B, L, D = emb.shape
    hi = jax.lax.Precision.HIGHEST
    feats = []
    for w, b in zip(conv_ws, conv_bs):
        F_num, k, _ = w.shape
        w32 = w.astype(jnp.bfloat16).astype(jnp.float32)
        l_out = L - k + 1
        conv = jnp.stack(
            [jnp.einsum('bld,fld->bf', emb[:, t:t + k, :], w32, precision=hi)
             for t in range(l_out)], axis=1) + b.astype(jnp.float32)[None, None, :]
        act = jnp.where(conv > 0, conv, LEAKY_SLOPE * conv)       # LeakyReLU
        feats.append(jnp.maximum(jnp.max(act, axis=1), 0.0))      # relu(maxpool)
    feat = jnp.concatenate(feats, axis=1)                         # (B, nb*F)
    return jnp.dot(feat, fc_w.astype(jnp.float32).T, precision=hi) \
        + fc_b.astype(jnp.float32)[None, :]


if __name__ == "__main__":
    # Small, module-consistent shapes.
    B = 2                # batch
    L = 16               # MAX_SENTENCE_SIZE (seq len)
    D = 32               # embedding_dim
    V = 50               # vocab_size
    F_num = 16           # filter_num
    O = 4                # output_size

    key = jax.random.PRNGKey(0)
    keys = jax.random.split(key, 10)

    tokens = jax.random.randint(keys[0], (B, L), 0, V, dtype=jnp.int32)
    emb_table = jax.random.normal(keys[1], (V, D), jnp.float32) * 0.1
    conv_ws = [jax.random.normal(keys[2 + i], (F_num, k, D), jnp.float32) * 0.1
               for i, k in enumerate(KERNEL_LIST)]
    conv_bs = [jax.random.normal(keys[5 + i], (F_num,), jnp.float32) * 0.1
               for i in range(len(KERNEL_LIST))]
    fc_w = jax.random.normal(keys[8], (O, F_num * len(KERNEL_LIST)), jnp.float32) * 0.1
    fc_b = jax.random.normal(keys[9], (O,), jnp.float32) * 0.1

    out = textcnn_forward(tokens, emb_table, conv_ws, conv_bs, fc_w, fc_b)
    out = jax.block_until_ready(out)

    ref = textcnn_reference(tokens, emb_table, conv_ws, conv_bs, fc_w, fc_b)
    assert out.shape == (B, O), out.shape
    assert jnp.allclose(out, ref, atol=1e-4, rtol=1e-4), (out, ref)

    print("KERNEL_OK")
</pallas_src>

<mosaic_0001>
module attributes {stable_mosaic.version = 11 : i64} {
  func.func @textcnn_kernel(%arg0: i32, %arg1: memref<8x512xbf16, #tpu.memory_space<vmem>>, %arg2: memref<96x128xbf16, #tpu.memory_space<vmem>>, %arg3: memref<128x128xbf16, #tpu.memory_space<vmem>>, %arg4: memref<160x128xbf16, #tpu.memory_space<vmem>>, %arg5: memref<1x384xf32, #tpu.memory_space<vmem>>, %arg6: memref<384x128xf32, #tpu.memory_space<vmem>>, %arg7: memref<1x128xf32, #tpu.memory_space<vmem>>, %arg8: memref<8x128xf32, #tpu.memory_space<vmem>>) attributes {dimension_semantics = [#tpu.dimension_semantics<parallel>], iteration_bounds = array<i64: 1>, scalar_prefetch = 0 : i64, scratch_operands = 0 : i64, tpu.core_type = #tpu.core_type<tc>, window_params = [{transform_indices = @transform_0, window_bounds = array<i64: 8, 512>}, {pipeline_mode = #tpu.pipeline_mode<synchronous>, transform_indices = @transform_1, window_bounds = array<i64: 96, 128>}, {pipeline_mode = #tpu.pipeline_mode<synchronous>, transform_indices = @transform_2, window_bounds = array<i64: 128, 128>}, {pipeline_mode = #tpu.pipeline_mode<synchronous>, transform_indices = @transform_3, window_bounds = array<i64: 160, 128>}, {pipeline_mode = #tpu.pipeline_mode<synchronous>, transform_indices = @transform_4, window_bounds = array<i64: 1, 384>}, {pipeline_mode = #tpu.pipeline_mode<synchronous>, transform_indices = @transform_5, window_bounds = array<i64: 384, 128>}, {pipeline_mode = #tpu.pipeline_mode<synchronous>, transform_indices = @transform_6, window_bounds = array<i64: 1, 128>}, {transform_indices = @transform_7, window_bounds = array<i64: 8, 128>}]} {
    %c0 = arith.constant 0 : index
    %c0_0 = arith.constant 0 : index
    %0 = vector.load %arg2[%c0, %c0_0] : memref<96x128xbf16, #tpu.memory_space<vmem>>, vector<96x128xbf16>
    %c0_1 = arith.constant 0 : index
    %c0_2 = arith.constant 0 : index
    %1 = vector.load %arg1[%c0_1, %c0_2] : memref<8x512xbf16, #tpu.memory_space<vmem>>, vector<8x96xbf16>
    %cst = arith.constant dense<0.000000e+00> : vector<8x128xf32>
    %2 = tpu.matmul %1, %0, %cst {dimension_numbers = #tpu.dot_dimension_numbers<[1], [0], [0], [1], [0, 0, 1, 1], [], []>} : vector<8x96xbf16>, vector<96x128xbf16>, vector<8x128xf32> -> vector<8x128xf32>
    %c0_3 = arith.constant 0 : index
    %c32 = arith.constant 32 : index
    %3 = vector.load %arg1[%c0_3, %c32] : memref<8x512xbf16, #tpu.memory_space<vmem>>, vector<8x96xbf16>
    %cst_4 = arith.constant dense<0.000000e+00> : vector<8x128xf32>
    %4 = tpu.matmul %3, %0, %cst_4 {dimension_numbers = #tpu.dot_dimension_numbers<[1], [0], [0], [1], [0, 0, 1, 1], [], []>} : vector<8x96xbf16>, vector<96x128xbf16>, vector<8x128xf32> -> vector<8x128xf32>
    %5 = arith.maximumf %2, %4 : vector<8x128xf32>
    %c0_5 = arith.constant 0 : index
    %c64 = arith.constant 64 : index
    %6 = vector.load %arg1[%c0_5, %c64] : memref<8x512xbf16, #tpu.memory_space<vmem>>, vector<8x96xbf16>
    %cst_6 = arith.constant dense<0.000000e+00> : vector<8x128xf32>
    %7 = tpu.matmul %6, %0, %cst_6 {dimension_numbers = #tpu.dot_dimension_numbers<[1], [0], [0], [1], [0, 0, 1, 1], [], []>} : vector<8x96xbf16>, vector<96x128xbf16>, vector<8x128xf32> -> vector<8x128xf32>
    %8 = arith.maximumf %5, %7 : vector<8x128xf32>
    %c0_7 = arith.constant 0 : index
    %c96 = arith.constant 96 : index
    %9 = vector.load %arg1[%c0_7, %c96] : memref<8x512xbf16, #tpu.memory_space<vmem>>, vector<8x96xbf16>
    %cst_8 = arith.constant dense<0.000000e+00> : vector<8x128xf32>
    %10 = tpu.matmul %9, %0, %cst_8 {dimension_numbers = #tpu.dot_dimension_numbers<[1], [0], [0], [1], [0, 0, 1, 1], [], []>} : vector<8x96xbf16>, vector<96x128xbf16>, vector<8x128xf32> -> vector<8x128xf32>
    %11 = arith.maximumf %8, %10 : vector<8x128xf32>
    %c0_9 = arith.constant 0 : index
    %c128 = arith.constant 128 : index
    %12 = vector.load %arg1[%c0_9, %c128] : memref<8x512xbf16, #tpu.memory_space<vmem>>, vector<8x96xbf16>
    %cst_10 = arith.constant dense<0.000000e+00> : vector<8x128xf32>
    %13 = tpu.matmul %12, %0, %cst_10 {dimension_numbers = #tpu.dot_dimension_numbers<[1], [0], [0], [1], [0, 0, 1, 1], [], []>} : vector<8x96xbf16>, vector<96x128xbf16>, vector<8x128xf32> -> vector<8x128xf32>
    %14 = arith.maximumf %11, %13 : vector<8x128xf32>
    %c0_11 = arith.constant 0 : index
    %c160 = arith.constant 160 : index
    %15 = vector.load %arg1[%c0_11, %c160] : memref<8x512xbf16, #tpu.memory_space<vmem>>, vector<8x96xbf16>
    %cst_12 = arith.constant dense<0.000000e+00> : vector<8x128xf32>
    %16 = tpu.matmul %15, %0, %cst_12 {dimension_numbers = #tpu.dot_dimension_numbers<[1], [0], [0], [1], [0, 0, 1, 1], [], []>} : vector<8x96xbf16>, vector<96x128xbf16>, vector<8x128xf32> -> vector<8x128xf32>
    %17 = arith.maximumf %14, %16 : vector<8x128xf32>
    %c0_13 = arith.constant 0 : index
    %c192 = arith.constant 192 : index
    %18 = vector.load %arg1[%c0_13, %c192] : memref<8x512xbf16, #tpu.memory_space<vmem>>, vector<8x96xbf16>
    %cst_14 = arith.constant dense<0.000000e+00> : vector<8x128xf32>
    %19 = tpu.matmul %18, %0, %cst_14 {dimension_numbers = #tpu.dot_dimension_numbers<[1], [0], [0], [1], [0, 0, 1, 1], [], []>} : vector<8x96xbf16>, vector<96x128xbf16>, vector<8x128xf32> -> vector<8x128xf32>
    %20 = arith.maximumf %17, %19 : vector<8x128xf32>
    %c0_15 = arith.constant 0 : index
    %c224 = arith.constant 224 : index
    %21 = vector.load %arg1[%c0_15, %c224] : memref<8x512xbf16, #tpu.memory_space<vmem>>, vector<8x96xbf16>
    %cst_16 = arith.constant dense<0.000000e+00> : vector<8x128xf32>
    %22 = tpu.matmul %21, %0, %cst_16 {dimension_numbers = #tpu.dot_dimension_numbers<[1], [0], [0], [1], [0, 0, 1, 1], [], []>} : vector<8x96xbf16>, vector<96x128xbf16>, vector<8x128xf32> -> vector<8x128xf32>
    %23 = arith.maximumf %20, %22 : vector<8x128xf32>
    %c0_17 = arith.constant 0 : index
    %c256 = arith.constant 256 : index
    %24 = vector.load %arg1[%c0_17, %c256] : memref<8x512xbf16, #tpu.memory_space<vmem>>, vector<8x96xbf16>
    %cst_18 = arith.constant dense<0.000000e+00> : vector<8x128xf32>
    %25 = tpu.matmul %24, %0, %cst_18 {dimension_numbers = #tpu.dot_dimension_numbers<[1], [0], [0], [1], [0, 0, 1, 1], [], []>} : vector<8x96xbf16>, vector<96x128xbf16>, vector<8x128xf32> -> vector<8x128xf32>
    %26 = arith.maximumf %23, %25 : vector<8x128xf32>
    %c0_19 = arith.constant 0 : index
    %c288 = arith.constant 288 : index
    %27 = vector.load %arg1[%c0_19, %c288] : memref<8x512xbf16, #tpu.memory_space<vmem>>, vector<8x96xbf16>
    %cst_20 = arith.constant dense<0.000000e+00> : vector<8x128xf32>
    %28 = tpu.matmul %27, %0, %cst_20 {dimension_numbers = #tpu.dot_dimension_numbers<[1], [0], [0], [1], [0, 0, 1, 1], [], []>} : vector<8x96xbf16>, vector<96x128xbf16>, vector<8x128xf32> -> vector<8x128xf32>
    %29 = arith.maximumf %26, %28 : vector<8x128xf32>
    %c0_21 = arith.constant 0 : index
    %c320 = arith.constant 320 : index
    %30 = vector.load %arg1[%c0_21, %c320] : memref<8x512xbf16, #tpu.memory_space<vmem>>, vector<8x96xbf16>
    %cst_22 = arith.constant dense<0.000000e+00> : vector<8x128xf32>
    %31 = tpu.matmul %30, %0, %cst_22 {dimension_numbers = #tpu.dot_dimension_numbers<[1], [0], [0], [1], [0, 0, 1, 1], [], []>} : vector<8x96xbf16>, vector<96x128xbf16>, vector<8x128xf32> -> vector<8x128xf32>
    %32 = arith.maximumf %29, %31 : vector<8x128xf32>
    %c0_23 = arith.constant 0 : index
    %c352 = arith.constant 352 : index
    %33 = vector.load %arg1[%c0_23, %c352] : memref<8x512xbf16, #tpu.memory_space<vmem>>, vector<8x96xbf16>
    %cst_24 = arith.constant dense<0.000000e+00> : vector<8x128xf32>
    %34 = tpu.matmul %33, %0, %cst_24 {dimension_numbers = #tpu.dot_dimension_numbers<[1], [0], [0], [1], [0, 0, 1, 1], [], []>} : vector<8x96xbf16>, vector<96x128xbf16>, vector<8x128xf32> -> vector<8x128xf32>
    %35 = arith.maximumf %32, %34 : vector<8x128xf32>
    %c0_25 = arith.constant 0 : index
    %c384 = arith.constant 384 : index
    %36 = vector.load %arg1[%c0_25, %c384] : memref<8x512xbf16, #tpu.memory_space<vmem>>, vector<8x96xbf16>
    %cst_26 = arith.constant dense<0.000000e+00> : vector<8x128xf32>
    %37 = tpu.matmul %36, %0, %cst_26 {dimension_numbers = #tpu.dot_dimension_numbers<[1], [0], [0], [1], [0, 0, 1, 1], [], []>} : vector<8x96xbf16>, vector<96x128xbf16>, vector<8x128xf32> -> vector<8x128xf32>
    %38 = arith.maximumf %35, %37 : vector<8x128xf32>
    %c0_27 = arith.constant 0 : index
    %c416 = arith.constant 416 : index
    %39 = vector.load %arg1[%c0_27, %c416] : memref<8x512xbf16, #tpu.memory_space<vmem>>, vector<8x96xbf16>
    %cst_28 = arith.constant dense<0.000000e+00> : vector<8x128xf32>
    %40 = tpu.matmul %39, %0, %cst_28 {dimension_numbers = #tpu.dot_dimension_numbers<[1], [0], [0], [1], [0, 0, 1, 1], [], []>} : vector<8x96xbf16>, vector<96x128xbf16>, vector<8x128xf32> -> vector<8x128xf32>
    %41 = arith.maximumf %38, %40 : vector<8x128xf32>
    %c0_29 = arith.constant 0 : index
    %c0_30 = arith.constant 0 : index
    %42 = vector.load %arg5[%c0_29, %c0_30] : memref<1x384xf32, #tpu.memory_space<vmem>>, vector<1x128xf32>
    %43 = vector.broadcast %42 : vector<1x128xf32> to vector<8x128xf32>
    %44 = arith.addf %41, %43 : vector<8x128xf32>
    %cst_31 = arith.constant 0.000000e+00 : f32
    %45 = vector.broadcast %cst_31 : f32 to vector<8x128xf32>
    %46 = arith.maximumf %44, %45 : vector<8x128xf32>
    %c0_32 = arith.constant 0 : index
    %c0_33 = arith.constant 0 : index
    %47 = vector.load %arg3[%c0_32, %c0_33] : memref<128x128xbf16, #tpu.memory_space<vmem>>, vector<128x128xbf16>
    %c0_34 = arith.constant 0 : index
    %c0_35 = arith.constant 0 : index
    %48 = vector.load %arg1[%c0_34, %c0_35] : memref<8x512xbf16, #tpu.memory_space<vmem>>, vector<8x128xbf16>
    %cst_36 = arith.constant dense<0.000000e+00> : vector<8x128xf32>
    %49 = tpu.matmul %48, %47, %cst_36 {dimension_numbers = #tpu.dot_dimension_numbers<[1], [0], [0], [1], [0, 0, 1, 1], [], []>} : vector<8x128xbf16>, vector<128x128xbf16>, vector<8x128xf32> -> vector<8x128xf32>
    %c0_37 = arith.constant 0 : index
    %c32_38 = arith.constant 32 : index
    %50 = vector.load %arg1[%c0_37, %c32_38] : memref<8x512xbf16, #tpu.memory_space<vmem>>, vector<8x128xbf16>
    %cst_39 = arith.constant dense<0.000000e+00> : vector<8x128xf32>
    %51 = tpu.matmul %50, %47, %cst_39 {dimension_numbers = #tpu.dot_dimension_numbers<[1], [0], [0], [1], [0, 0, 1, 1], [], []>} : vector<8x128xbf16>, vector<128x128xbf16>, vector<8x128xf32> -> vector<8x128xf32>
    %52 = arith.maximumf %49, %51 : vector<8x128xf32>
    %c0_40 = arith.constant 0 : index
    %c64_41 = arith.constant 64 : index
    %53 = vector.load %arg1[%c0_40, %c64_41] : memref<8x512xbf16, #tpu.memory_space<vmem>>, vector<8x128xbf16>
    %cst_42 = arith.constant dense<0.000000e+00> : vector<8x128xf32>
    %54 = tpu.matmul %53, %47, %cst_42 {dimension_numbers = #tpu.dot_dimension_numbers<[1], [0], [0], [1], [0, 0, 1, 1], [], []>} : vector<8x128xbf16>, vector<128x128xbf16>, vector<8x128xf32> -> vector<8x128xf32>
    %55 = arith.maximumf %52, %54 : vector<8x128xf32>
    %c0_43 = arith.constant 0 : index
    %c96_44 = arith.constant 96 : index
    %56 = vector.load %arg1[%c0_43, %c96_44] : memref<8x512xbf16, #tpu.memory_space<vmem>>, vector<8x128xbf16>
    %cst_45 = arith.constant dense<0.000000e+00> : vector<8x128xf32>
    %57 = tpu.matmul %56, %47, %cst_45 {dimension_numbers = #tpu.dot_dimension_numbers<[1], [0], [0], [1], [0, 0, 1, 1], [], []>} : vector<8x128xbf16>, vector<128x128xbf16>, vector<8x128xf32> -> vector<8x128xf32>
    %58 = arith.maximumf %55, %57 : vector<8x128xf32>
    %c0_46 = arith.constant 0 : index
    %c128_47 = arith.constant 128 : index
    %59 = vector.load %arg1[%c0_46, %c128_47] : memref<8x512xbf16, #tpu.memory_space<vmem>>, vector<8x128xbf16>
    %cst_48 = arith.constant dense<0.000000e+00> : vector<8x128xf32>
    %60 = tpu.matmul %59, %47, %cst_48 {dimension_numbers = #tpu.dot_dimension_numbers<[1], [0], [0], [1], [0, 0, 1, 1], [], []>} : vector<8x128xbf16>, vector<128x128xbf16>, vector<8x128xf32> -> vector<8x128xf32>
    %61 = arith.maximumf %58, %60 : vector<8x128xf32>
    %c0_49 = arith.constant 0 : index
    %c160_50 = arith.constant 160 : index
    %62 = vector.load %arg1[%c0_49, %c160_50] : memref<8x512xbf16, #tpu.memory_space<vmem>>, vector<8x128xbf16>
    %cst_51 = arith.constant dense<0.000000e+00> : vector<8x128xf32>
    %63 = tpu.matmul %62, %47, %cst_51 {dimension_numbers = #tpu.dot_dimension_numbers<[1], [0], [0], [1], [0, 0, 1, 1], [], []>} : vector<8x128xbf16>, vector<128x128xbf16>, vector<8x128xf32> -> vector<8x128xf32>
    %64 = arith.maximumf %61, %63 : vector<8x128xf32>
    %c0_52 = arith.constant 0 : index
    %c192_53 = arith.constant 192 : index
    %65 = vector.load %arg1[%c0_52, %c192_53] : memref<8x512xbf16, #tpu.memory_space<vmem>>, vector<8x128xbf16>
    %cst_54 = arith.constant dense<0.000000e+00> : vector<8x128xf32>
    %66 = tpu.matmul %65, %47, %cst_54 {dimension_numbers = #tpu.dot_dimension_numbers<[1], [0], [0], [1], [0, 0, 1, 1], [], []>} : vector<8x128xbf16>, vector<128x128xbf16>, vector<8x128xf32> -> vector<8x128xf32>
    %67 = arith.maximumf %64, %66 : vector<8x128xf32>
    %c0_55 = arith.constant 0 : index
    %c224_56 = arith.constant 224 : index
    %68 = vector.load %arg1[%c0_55, %c224_56] : memref<8x512xbf16, #tpu.memory_space<vmem>>, vector<8x128xbf16>
    %cst_57 = arith.constant dense<0.000000e+00> : vector<8x128xf32>
    %69 = tpu.matmul %68, %47, %cst_57 {dimension_numbers = #tpu.dot_dimension_numbers<[1], [0], [0], [1], [0, 0, 1, 1], [], []>} : vector<8x128xbf16>, vector<128x128xbf16>, vector<8x128xf32> -> vector<8x128xf32>
    %70 = arith.maximumf %67, %69 : vector<8x128xf32>
    %c0_58 = arith.constant 0 : index
    %c256_59 = arith.constant 256 : index
    %71 = vector.load %arg1[%c0_58, %c256_59] : memref<8x512xbf16, #tpu.memory_space<vmem>>, vector<8x128xbf16>
    %cst_60 = arith.constant dense<0.000000e+00> : vector<8x128xf32>
    %72 = tpu.matmul %71, %47, %cst_60 {dimension_numbers = #tpu.dot_dimension_numbers<[1], [0], [0], [1], [0, 0, 1, 1], [], []>} : vector<8x128xbf16>, vector<128x128xbf16>, vector<8x128xf32> -> vector<8x128xf32>
    %73 = arith.maximumf %70, %72 : vector<8x128xf32>
    %c0_61 = arith.constant 0 : index
    %c288_62 = arith.constant 288 : index
    %74 = vector.load %arg1[%c0_61, %c288_62] : memref<8x512xbf16, #tpu.memory_space<vmem>>, vector<8x128xbf16>
    %cst_63 = arith.constant dense<0.000000e+00> : vector<8x128xf32>
    %75 = tpu.matmul %74, %47, %cst_63 {dimension_numbers = #tpu.dot_dimension_numbers<[1], [0], [0], [1], [0, 0, 1, 1], [], []>} : vector<8x128xbf16>, vector<128x128xbf16>, vector<8x128xf32> -> vector<8x128xf32>
    %76 = arith.maximumf %73, %75 : vector<8x128xf32>
    %c0_64 = arith.constant 0 : index
    %c320_65 = arith.constant 320 : index
    %77 = vector.load %arg1[%c0_64, %c320_65] : memref<8x512xbf16, #tpu.memory_space<vmem>>, vector<8x128xbf16>
    %cst_66 = arith.constant dense<0.000000e+00> : vector<8x128xf32>
    %78 = tpu.matmul %77, %47, %cst_66 {dimension_numbers = #tpu.dot_dimension_numbers<[1], [0], [0], [1], [0, 0, 1, 1], [], []>} : vector<8x128xbf16>, vector<128x128xbf16>, vector<8x128xf32> -> vector<8x128xf32>
    %79 = arith.maximumf %76, %78 : vector<8x128xf32>
    %c0_67 = arith.constant 0 : index
    %c352_68 = arith.constant 352 : index
    %80 = vector.load %arg1[%c0_67, %c352_68] : memref<8x512xbf16, #tpu.memory_space<vmem>>, vector<8x128xbf16>
    %cst_69 = arith.constant dense<0.000000e+00> : vector<8x128xf32>
    %81 = tpu.matmul %80, %47, %cst_69 {dimension_numbers = #tpu.dot_dimension_numbers<[1], [0], [0], [1], [0, 0, 1, 1], [], []>} : vector<8x128xbf16>, vector<128x128xbf16>, vector<8x128xf32> -> vector<8x128xf32>
    %82 = arith.maximumf %79, %81 : vector<8x128xf32>
    %c0_70 = arith.constant 0 : index
    %c384_71 = arith.constant 384 : index
    %83 = vector.load %arg1[%c0_70, %c384_71] : memref<8x512xbf16, #tpu.memory_space<vmem>>, vector<8x128xbf16>
    %cst_72 = arith.constant dense<0.000000e+00> : vector<8x128xf32>
    %84 = tpu.matmul %83, %47, %cst_72 {dimension_numbers = #tpu.dot_dimension_numbers<[1], [0], [0], [1], [0, 0, 1, 1], [], []>} : vector<8x128xbf16>, vector<128x128xbf16>, vector<8x128xf32> -> vector<8x128xf32>
    %85 = arith.maximumf %82, %84 : vector<8x128xf32>
    %c0_73 = arith.constant 0 : index
    %c128_74 = arith.constant 128 : index
    %86 = vector.load %arg5[%c0_73, %c128_74] : memref<1x384xf32, #tpu.memory_space<vmem>>, vector<1x128xf32>
    %87 = vector.broadcast %86 : vector<1x128xf32> to vector<8x128xf32>
    %88 = arith.addf %85, %87 : vector<8x128xf32>
    %cst_75 = arith.constant 0.000000e+00 : f32
    %89 = vector.broadcast %cst_75 : f32 to vector<8x128xf32>
    %90 = arith.maximumf %88, %89 : vector<8x128xf32>
    %c0_76 = arith.constant 0 : index
    %c0_77 = arith.constant 0 : index
    %91 = vector.load %arg4[%c0_76, %c0_77] : memref<160x128xbf16, #tpu.memory_space<vmem>>, vector<160x128xbf16>
    %c0_78 = arith.constant 0 : index
    %c0_79 = arith.constant 0 : index
    %92 = vector.load %arg1[%c0_78, %c0_79] : memref<8x512xbf16, #tpu.memory_space<vmem>>, vector<8x160xbf16>
    %cst_80 = arith.constant dense<0.000000e+00> : vector<8x128xf32>
    %93 = tpu.matmul %92, %91, %cst_80 {dimension_numbers = #tpu.dot_dimension_numbers<[1], [0], [0], [1], [0, 0, 1, 1], [], []>} : vector<8x160xbf16>, vector<160x128xbf16>, vector<8x128xf32> -> vector<8x128xf32>
    %c0_81 = arith.constant 0 : index
    %c32_82 = arith.constant 32 : index
    %94 = vector.load %arg1[%c0_81, %c32_82] : memref<8x512xbf16, #tpu.memory_space<vmem>>, vector<8x160xbf16>
    %cst_83 = arith.constant dense<0.000000e+00> : vector<8x128xf32>
    %95 = tpu.matmul %94, %91, %cst_83 {dimension_numbers = #tpu.dot_dimension_numbers<[1], [0], [0], [1], [0, 0, 1, 1], [], []>} : vector<8x160xbf16>, vector<160x128xbf16>, vector<8x128xf32> -> vector<8x128xf32>
    %96 = arith.maximumf %93, %95 : vector<8x128xf32>
    %c0_84 = arith.constant 0 : index
    %c64_85 = arith.constant 64 : index
    %97 = vector.load %arg1[%c0_84, %c64_85] : memref<8x512xbf16, #tpu.memory_space<vmem>>, vector<8x160xbf16>
    %cst_86 = arith.constant dense<0.000000e+00> : vector<8x128xf32>
    %98 = tpu.matmul %97, %91, %cst_86 {dimension_numbers = #tpu.dot_dimension_numbers<[1], [0], [0], [1], [0, 0, 1, 1], [], []>} : vector<8x160xbf16>, vector<160x128xbf16>, vector<8x128xf32> -> vector<8x128xf32>
    %99 = arith.maximumf %96, %98 : vector<8x128xf32>
    %c0_87 = arith.constant 0 : index
    %c96_88 = arith.constant 96 : index
    %100 = vector.load %arg1[%c0_87, %c96_88] : memref<8x512xbf16, #tpu.memory_space<vmem>>, vector<8x160xbf16>
    %cst_89 = arith.constant dense<0.000000e+00> : vector<8x128xf32>
    %101 = tpu.matmul %100, %91, %cst_89 {dimension_numbers = #tpu.dot_dimension_numbers<[1], [0], [0], [1], [0, 0, 1, 1], [], []>} : vector<8x160xbf16>, vector<160x128xbf16>, vector<8x128xf32> -> vector<8x128xf32>
    %102 = arith.maximumf %99, %101 : vector<8x128xf32>
    %c0_90 = arith.constant 0 : index
    %c128_91 = arith.constant 128 : index
    %103 = vector.load %arg1[%c0_90, %c128_91] : memref<8x512xbf16, #tpu.memory_space<vmem>>, vector<8x160xbf16>
    %cst_92 = arith.constant dense<0.000000e+00> : vector<8x128xf32>
    %104 = tpu.matmul %103, %91, %cst_92 {dimension_numbers = #tpu.dot_dimension_numbers<[1], [0], [0], [1], [0, 0, 1, 1], [], []>} : vector<8x160xbf16>, vector<160x128xbf16>, vector<8x128xf32> -> vector<8x128xf32>
    %105 = arith.maximumf %102, %104 : vector<8x128xf32>
    %c0_93 = arith.constant 0 : index
    %c160_94 = arith.constant 160 : index
    %106 = vector.load %arg1[%c0_93, %c160_94] : memref<8x512xbf16, #tpu.memory_space<vmem>>, vector<8x160xbf16>
    %cst_95 = arith.constant dense<0.000000e+00> : vector<8x128xf32>
    %107 = tpu.matmul %106, %91, %cst_95 {dimension_numbers = #tpu.dot_dimension_numbers<[1], [0], [0], [1], [0, 0, 1, 1], [], []>} : vector<8x160xbf16>, vector<160x128xbf16>, vector<8x128xf32> -> vector<8x128xf32>
    %108 = arith.maximumf %105, %107 : vector<8x128xf32>
    %c0_96 = arith.constant 0 : index
    %c192_97 = arith.constant 192 : index
    %109 = vector.load %arg1[%c0_96, %c192_97] : memref<8x512xbf16, #tpu.memory_space<vmem>>, vector<8x160xbf16>
    %cst_98 = arith.constant dense<0.000000e+00> : vector<8x128xf32>
    %110 = tpu.matmul %109, %91, %cst_98 {dimension_numbers = #tpu.dot_dimension_numbers<[1], [0], [0], [1], [0, 0, 1, 1], [], []>} : vector<8x160xbf16>, vector<160x128xbf16>, vector<8x128xf32> -> vector<8x128xf32>
    %111 = arith.maximumf %108, %110 : vector<8x128xf32>
    %c0_99 = arith.constant 0 : index
    %c224_100 = arith.constant 224 : index
    %112 = vector.load %arg1[%c0_99, %c224_100] : memref<8x512xbf16, #tpu.memory_space<vmem>>, vector<8x160xbf16>
    %cst_101 = arith.constant dense<0.000000e+00> : vector<8x128xf32>
    %113 = tpu.matmul %112, %91, %cst_101 {dimension_numbers = #tpu.dot_dimension_numbers<[1], [0], [0], [1], [0, 0, 1, 1], [], []>} : vector<8x160xbf16>, vector<160x128xbf16>, vector<8x128xf32> -> vector<8x128xf32>
    %114 = arith.maximumf %111, %113 : vector<8x128xf32>
    %c0_102 = arith.constant 0 : index
    %c256_103 = arith.constant 256 : index
    %115 = vector.load %arg1[%c0_102, %c256_103] : memref<8x512xbf16, #tpu.memory_space<vmem>>, vector<8x160xbf16>
    %cst_104 = arith.constant dense<0.000000e+00> : vector<8x128xf32>
    %116 = tpu.matmul %115, %91, %cst_104 {dimension_numbers = #tpu.dot_dimension_numbers<[1], [0], [0], [1], [0, 0, 1, 1], [], []>} : vector<8x160xbf16>, vector<160x128xbf16>, vector<8x128xf32> -> vector<8x128xf32>
    %117 = arith.maximumf %114, %116 : vector<8x128xf32>
    %c0_105 = arith.constant 0 : index
    %c288_106 = arith.constant 288 : index
    %118 = vector.load %arg1[%c0_105, %c288_106] : memref<8x512xbf16, #tpu.memory_space<vmem>>, vector<8x160xbf16>
    %cst_107 = arith.constant dense<0.000000e+00> : vector<8x128xf32>
    %119 = tpu.matmul %118, %91, %cst_107 {dimension_numbers = #tpu.dot_dimension_numbers<[1], [0], [0], [1], [0, 0, 1, 1], [], []>} : vector<8x160xbf16>, vector<160x128xbf16>, vector<8x128xf32> -> vector<8x128xf32>
    %120 = arith.maximumf %117, %119 : vector<8x128xf32>
    %c0_108 = arith.constant 0 : index
    %c320_109 = arith.constant 320 : index
    %121 = vector.load %arg1[%c0_108, %c320_109] : memref<8x512xbf16, #tpu.memory_space<vmem>>, vector<8x160xbf16>
    %cst_110 = arith.constant dense<0.000000e+00> : vector<8x128xf32>
    %122 = tpu.matmul %121, %91, %cst_110 {dimension_numbers = #tpu.dot_dimension_numbers<[1], [0], [0], [1], [0, 0, 1, 1], [], []>} : vector<8x160xbf16>, vector<160x128xbf16>, vector<8x128xf32> -> vector<8x128xf32>
    %123 = arith.maximumf %120, %122 : vector<8x128xf32>
    %c0_111 = arith.constant 0 : index
    %c352_112 = arith.constant 352 : index
    %124 = vector.load %arg1[%c0_111, %c352_112] : memref<8x512xbf16, #tpu.memory_space<vmem>>, vector<8x160xbf16>
    %cst_113 = arith.constant dense<0.000000e+00> : vector<8x128xf32>
    %125 = tpu.matmul %124, %91, %cst_113 {dimension_numbers = #tpu.dot_dimension_numbers<[1], [0], [0], [1], [0, 0, 1, 1], [], []>} : vector<8x160xbf16>, vector<160x128xbf16>, vector<8x128xf32> -> vector<8x128xf32>
    %126 = arith.maximumf %123, %125 : vector<8x128xf32>
    %c0_114 = arith.constant 0 : index
    %c256_115 = arith.constant 256 : index
    %127 = vector.load %arg5[%c0_114, %c256_115] : memref<1x384xf32, #tpu.memory_space<vmem>>, vector<1x128xf32>
    %128 = vector.broadcast %127 : vector<1x128xf32> to vector<8x128xf32>
    %129 = arith.addf %126, %128 : vector<8x128xf32>
    %cst_116 = arith.constant 0.000000e+00 : f32
    %130 = vector.broadcast %cst_116 : f32 to vector<8x128xf32>
    %131 = arith.maximumf %129, %130 : vector<8x128xf32>
    %132 = tpu.concatenate %46, %90, %131 in 1 : vector<8x128xf32>, vector<8x128xf32>, vector<8x128xf32> -> vector<8x384xf32>
    %c0_117 = arith.constant 0 : index
    %c0_118 = arith.constant 0 : index
    %133 = vector.load %arg6[%c0_117, %c0_118] : memref<384x128xf32, #tpu.memory_space<vmem>>, vector<384x128xf32>
    %cst_119 = arith.constant dense<0.000000e+00> : vector<8x128xf32>
    %134 = tpu.matmul %132, %133, %cst_119 {dimension_numbers = #tpu.dot_dimension_numbers<[1], [0], [0], [1], [0, 0, 1, 1], [], []>} : vector<8x384xf32>, vector<384x128xf32>, vector<8x128xf32> -> vector<8x128xf32>
    %c0_120 = arith.constant 0 : index
    %c0_121 = arith.constant 0 : index
    %135 = vector.load %arg7[%c0_120, %c0_121] : memref<1x128xf32, #tpu.memory_space<vmem>>, vector<1x128xf32>
    %136 = vector.broadcast %135 : vector<1x128xf32> to vector<8x128xf32>
    %137 = arith.addf %134, %136 : vector<8x128xf32>
    %c0_122 = arith.constant 0 : index
    %c0_123 = arith.constant 0 : index
    %138 = vector.load %arg8[%c0_122, %c0_123] : memref<8x128xf32, #tpu.memory_space<vmem>>, vector<8x128xf32>
    tpu.vector_store %arg8[%c0_122, %c0_123], %137 {strides = array<i32>} : memref<8x128xf32, #tpu.memory_space<vmem>>, vector<8x128xf32>,
    return
  }
  func.func @transform_0(%arg0: i32) -> (i32, i32) {
    %c0_i32 = arith.constant 0 : i32
    %c0_i32_0 = arith.constant 0 : i32
    return %arg0, %c0_i32 : i32, i32
  }
  func.func @transform_1(%arg0: i32) -> (i32, i32) {
    %c0_i32 = arith.constant 0 : i32
    %c0_i32_0 = arith.constant 0 : i32
    %c0_i32_1 = arith.constant 0 : i32
    return %c0_i32, %c0_i32_0 : i32, i32
  }
  func.func @transform_2(%arg0: i32) -> (i32, i32) {
    %c0_i32 = arith.constant 0 : i32
    %c0_i32_0 = arith.constant 0 : i32
    %c0_i32_1 = arith.constant 0 : i32
    return %c0_i32, %c0_i32_0 : i32, i32
  }
  func.func @transform_3(%arg0: i32) -> (i32, i32) {
    %c0_i32 = arith.constant 0 : i32
    %c0_i32_0 = arith.constant 0 : i32
    %c0_i32_1 = arith.constant 0 : i32
    return %c0_i32, %c0_i32_0 : i32, i32
  }
  func.func @transform_4(%arg0: i32) -> (i32, i32) {
    %c0_i32 = arith.constant 0 : i32
    %c0_i32_0 = arith.constant 0 : i32
    %c0_i32_1 = arith.constant 0 : i32
    return %c0_i32, %c0_i32_0 : i32, i32
  }
  func.func @transform_5(%arg0: i32) -> (i32, i32) {
    %c0_i32 = arith.constant 0 : i32
    %c0_i32_0 = arith.constant 0 : i32
    %c0_i32_1 = arith.constant 0 : i32
    return %c0_i32, %c0_i32_0 : i32, i32
  }
  func.func @transform_6(%arg0: i32) -> (i32, i32) {
    %c0_i32 = arith.constant 0 : i32
    %c0_i32_0 = arith.constant 0 : i32
    %c0_i32_1 = arith.constant 0 : i32
    return %c0_i32, %c0_i32_0 : i32, i32
  }
  func.func @transform_7(%arg0: i32) -> (i32, i32) {
    %c0_i32 = arith.constant 0 : i32
    %c0_i32_0 = arith.constant 0 : i32
    return %arg0, %c0_i32 : i32, i32
  }
}

</mosaic_0001>

<bundles_post_ra>
// kernel: tpu_custom_call.1
= control target key start
LH: loop header
LB: loop body
LE: loop exit
PB: predicated region body
PF: predicated region fallthrough
CT: control target
= control target key end

     0   :  { %12 = vsyncpa [#allocation3], 0  ;;  %s4389_s0 = inlined_call_operand.hbm [shape: bf16[8,512], index: 0, kind: input, shape index: {}]   ;;  %s4390_s1 = inlined_call_operand.hbm [shape: bf16[96,128], index: 1, kind: input, shape index: {}]   ;;  %s4391_s2 = inlined_call_operand.hbm [shape: bf16[128,128], index: 2, kind: input, shape index: {}]   ;;  %s4392_s3 = inlined_call_operand.hbm [shape: bf16[160,128], index: 3, kind: input, shape index: {}]   ;;  %s4393_s4 = inlined_call_operand.vmem [shape: f32[1,384], index: 4, kind: input, shape index: {}]   ;;  %s4394_s5 = inlined_call_operand.hbm [shape: f32[384,128], index: 5, kind: input, shape index: {}]   ;;  %s4395_s6 = inlined_call_operand.vmem [shape: f32[1,128], index: 6, kind: input, shape index: {}]   ;;  %s4396_s7 = inlined_call_operand.hbm [shape: f32[8,128], index: 7, kind: output, shape index: {}]  }
   0x1   :  { %13 = vsyncpa [#allocation6], 0 }
   0x2   :  { %14 = vsyncpa [#allocation9], 0 }
   0x3   :  { %15 = vsyncpa [#allocation4], 0  ;;  %s3332_s24 = smov [#allocation5]  }
   0x4   :  { %s31_s25 = sshll.u32 %s3332_s24, 4  ;;  %s32_s25 = int_to_ptr.vmem [resolvable:$true] %s31_s25 }
   0x5   :  { %s3212_s26 = scalar_lea.vmem %s32_s25, 768  ;;  %p3217_p1 = scmp.lt.s32.totalorder %s32_s25, %s32_s25 }
   0x6   :  { %p3213_p0 = scmp.ne.s32.totalorder %s32_s25, %s3212_s26  ;;  %p3218_p2 = scmp.lt.s32.totalorder %s3212_s26, %s3212_s26 }
   0x8   :  { %p3219_p3 = por %p3218_p2, %p3217_p1 }
   0xa   :  { %p3220_p4 = pnand %p3219_p3, %p3213_p0 }
   0xc   :  { %3223 = shalt.err (!%p3220_p4)
}
   0xd   :  { %s3333_s27 = smov 64   ;;  %s3334_s28 = smov 4  }
   0xe   :  { %37 = dma.hbm_to_vmem [thread:$0]  %s4390_s1, 768, %s32_s25, [#allocation6], %s3333_s27, %s3333_s27, %s3334_s28  }
   0xf   :  { %s3335_s8 = smov [#allocation8]   ;;  %s3336_s10 = smov [#allocation2]  }
  0x10   :  { %s55_s9 = sshll.u32 %s3335_s8, 4  ;;  %s22_s11 = sshll.u32 %s3336_s10, 4  ;;  %s56_s9 = int_to_ptr.vmem [resolvable:$true] %s55_s9  ;;  %s23_s11 = int_to_ptr.vmem [resolvable:$true] %s22_s11 }
  0x11   :  { %s3232_s12 = scalar_lea.vmem %s56_s9, 1280  ;;  %p3237_p6 = scmp.lt.s32.totalorder %s56_s9, %s56_s9 }
  0x12   :  { %p3233_p5 = scmp.ne.s32.totalorder %s56_s9, %s3232_s12  ;;  %p3238_p7 = scmp.lt.s32.totalorder %s3232_s12, %s3232_s12 }
  0x14   :  { %p3239_p8 = por %p3238_p7, %p3237_p6 }
  0x16   :  { %p3240_p9 = pnand %p3239_p8, %p3233_p5 }
  0x18   :  { %3243 = shalt.err (!%p3240_p9)
}
  0x19   :  { %61 = dma.hbm_to_vmem [thread:$0]  %s4392_s3, 1280, %s56_s9, [#allocation9], %s3333_s27, %s3333_s27, %s3334_s28  }
  0x1a   :  { %s3252_s1 = scalar_lea.vmem %s23_s11, 256  ;;  %p3257_p11 = scmp.lt.s32.totalorder %s23_s11, %s23_s11 }
  0x1b   :  { %p3253_p10 = scmp.ne.s32.totalorder %s23_s11, %s3252_s1  ;;  %p3258_p12 = scmp.lt.s32.totalorder %s3252_s1, %s3252_s1 }
  0x1d   :  { %p3259_p13 = por %p3258_p12, %p3257_p11 }
  0x1f   :  { %p3260_p0 = pnand %p3259_p13, %p3253_p10 }
  0x21   :  { %3263 = shalt.err (!%p3260_p0)
}
  0x22   :  { %25 = dma.hbm_to_vmem [thread:$0]  %s4389_s0, 256, %s23_s11, [#allocation3]  }
  0x23   :  { %s3337_s17 = smov [#allocation7]   ;;  %s3338_s19 = smov [#allocation10]  }
  0x24   :  { %s43_s18 = sshll.u32 %s3337_s17, 4  ;;  %s69_s20 = sshll.u32 %s3338_s19, 4  ;;  %s44_s18 = int_to_ptr.vmem [resolvable:$true] %s43_s18  ;;  %s70_s20 = int_to_ptr.vmem [resolvable:$true] %s69_s20 }
  0x25   :  { %s3272_s21 = scalar_lea.vmem %s44_s18, 1024  ;;  %p3277_p2 = scmp.lt.s32.totalorder %s44_s18, %s44_s18 }
  0x26   :  { %p3273_p1 = scmp.ne.s32.totalorder %s44_s18, %s3272_s21  ;;  %p3278_p3 = scmp.lt.s32.totalorder %s3272_s21, %s3272_s21 }
  0x28   :  { %p3279_p4 = por %p3278_p3, %p3277_p2 }
  0x2a   :  { %p3280_p5 = pnand %p3279_p4, %p3273_p1 }
  0x2c   :  { %3283 = shalt.err (!%p3280_p5)
}
  0x2d   :  { %49 = dma.hbm_to_vmem [thread:$0]  %s4391_s2, 1024, %s44_s18, [#allocation6], %s3333_s27, %s3333_s27, %s3334_s28  }
  0x2e   :  { %s3292_s0 = scalar_lea.vmem %s70_s20, 6144  ;;  %p3297_p7 = scmp.lt.s32.totalorder %s70_s20, %s70_s20 }
  0x2f   :  { %p3293_p6 = scmp.ne.s32.totalorder %s70_s20, %s3292_s0  ;;  %p3298_p8 = scmp.lt.s32.totalorder %s3292_s0, %s3292_s0 }
  0x31   :  { %p3299_p9 = por %p3298_p8, %p3297_p7 }
  0x33   :  { %p3300_p10 = pnand %p3299_p9, %p3293_p6 }
  0x35   :  { %3303 = shalt.err (!%p3300_p10)
}
  0x36   :  { %s3339_s23 = smov 128   ;;  %s3340_s24 = smov 8  }
  0x37   :  { %75 = dma.hbm_to_vmem [thread:$0]  %s4394_s5, 6144, %s70_s20, [#allocation9], %s3339_s23, %s3339_s23, %s3340_s24  }
  0x38   :  { %3324 = dma.done.wait [#allocation3], 256  }
  0x39   :  { %3325 = vsyncadd [#allocation3], 4294967040 }
  0x3a   :  { %3326 = dma.done.wait [#allocation6], 1792  }
  0x3b   :  { %3327 = vsyncadd [#allocation6], 4294965504 }
  0x3c   :  { %3328 = dma.done.wait [#allocation9], 7424  }
  0x3d   :  { %3329 = vsyncadd [#allocation9], 4294959872  ;;  %v3341_v0 = vmov 0.0   ;;  %vm3342_vm0 = vmmov 0   ;;  %v236_v1 = vld [vmem:[#allocation2] sm:$0xff]  ;;  %v3423_v5 = vld [vmem:[#allocation5 + $0x28] sm:$0xff]  }
  0x3e   :  { %2635 = vmatprep.subr.bf16.mxu1 %v3341_v0  ;;  %2647 = vmatprep.mubr.msk.bf16.mxu1 %vm3342_vm0, %v3341_v0  ;;  %v3417_v2 = vld [vmem:[#allocation2] sm:$0xf]  ;;  %v3419_v3 = vcombine.low %v236_v1, %v236_v1  ;;  %s3343_s2 = smov 96   ;;  %v3428_v6 = vcombine.high %v236_v1, %v236_v1  ;;  %v436_v7 = vld [vmem:[#allocation2 + $0x4] sm:$0xff]  ;;  %v3431_v8 = vld [vmem:[#allocation5 + $0x20] sm:$0xff]   ;;  %s3344_s5 = smov 32  }
  0x3f   :  { %2667 = vmatprep.subr.bf16.mxu0 %v3341_v0  ;;  %2679 = vmatprep.mubr.msk.bf16.mxu0 %vm3342_vm0, %v3341_v0  ;;  %v2311_v4 = vcombine.low %v3417_v2, %v3417_v2  ;;  %v3440_v9 = vcombine.low %v436_v7, %v436_v7  ;;  %v3442_v10 = vld [vmem:[#allocation2 + $0x4] sm:$0xf]  ;;  %v3444_v11 = vld [vmem:[#allocation5 + $0x18] sm:$0xff]   ;;  %v3456_v13 = vcombine.high %v436_v7, %v436_v7  ;;  %v3464_v15 = vld [vmem:[#allocation5 + $0x8] sm:$0xff]   ;;  %vm143_vm1 = vcmask 785408   ;;  %s3346_s12 = smov [#allocation11]  }
  0x40   :  { %242 = vrot.lane.b32.xlu0 %v3419_v3, %s3333_s27  ;;  %2636 = vmatpush3.bf16.msra.mxu1 %v3423_v5  ;;  %v2318_v12 = vcombine.low %v3442_v10, %v3442_v10  ;;  %v3458_v14 = vld [vmem:[#allocation5 + $0x10] sm:$0xff]   ;;  %v634_v16 = vld [vmem:[#allocation2 + $0x8] sm:$0xff]  ;;  %v3473_v17 = vld [vmem:[#allocation5] sm:$0xff]   ;;  %vm246_vm2 = vcmask 523264   ;;  %vm296_vm3 = vcmask 261120   ;;  %s2293_s13 = sshll.u32 %s3346_s12, 4  ;;  %s2294_s13 = int_to_ptr.vmem [resolvable:$true] %s2293_s13 }
  0x41   :  { %190 = vrot.lane.b32.xlu1 %v2311_v4, %s3343_s2  ;;  %2668 = vmatpush3.bf16.msra.mxu0 %v3423_v5  ;;  %v3479_v18 = vcombine.low %v634_v16, %v634_v16  ;;  %v3481_v19 = vcombine.high %v634_v16, %v634_v16  ;;  %v3484_v20 = vld [vmem:[#allocation2 + $0x8] sm:$0xf]  ;;  %v3499_v22 = vld [vmem:[#allocation2 + $0xc] sm:$0xf]  ;;  %v3737_v49 = vld [vmem:[#allocation7 + $0x38] sm:$0xff]   ;;  %p3309_p12 = scmp.lt.s32.totalorder %s2294_s13, %s2294_s13 }
  0x42   :  { %2637 = vmatprep.subr.bf16.mxu1 %v3341_v0  ;;  %2669 = vmatprep.subr.bf16.mxu0 %v3341_v0  ;;  %v2325_v21 = vcombine.low %v3484_v20, %v3484_v20  ;;  %v2332_v23 = vcombine.low %v3499_v22, %v3499_v22  ;;  %v3745_v50 = vld [vmem:[#allocation7 + $0x30] sm:$0xff]   ;;  %v3753_v51 = vld [vmem:[#allocation7 + $0x28] sm:$0xff]   ;;  %v3759_v52 = vld [vmem:[#allocation7 + $0x20] sm:$0xff]  }
  0x43   :  { %v3765_v53 = vld [vmem:[#allocation7 + $0x18] sm:$0xff]   ;;  %v3771_v55 = vld [vmem:[#allocation7 + $0x10] sm:$0xff]   ;;  %v3780_v56 = vld [vmem:[#allocation7 + $0x8] sm:$0xff]  }
  0x44   :  { %244 = vrot.lane.b32.xlu0 %v3428_v6, %s3333_s27  ;;  %2638 = vmatpush3.bf16.msra.mxu1 %v3431_v8  ;;  %v3786_v57 = vld [vmem:[#allocation7] sm:$0xff]  }
  0x45   :  { %292 = vrot.lane.b32.xlu1 %v3419_v3, %s3344_s5  ;;  %2670 = vmatpush3.bf16.msra.mxu0 %v3431_v8 }
  0x46   :  { %2639 = vmatprep.subr.bf16.mxu1 %v3341_v0  ;;  %2671 = vmatprep.subr.bf16.mxu0 %v3341_v0 }
  0x48   :  { %294 = vrot.lane.b32.xlu0 %v3428_v6, %s3344_s5  ;;  %2640 = vmatpush3.bf16.msra.mxu1 %v3444_v11 }
  0x49   :  { %442 = vrot.lane.b32.xlu1 %v3440_v9, %s3333_s27  ;;  %2672 = vmatpush3.bf16.msra.mxu0 %v3444_v11 }
  0x4a   :  { %2641 = vmatprep.subr.bf16.mxu1 %v3341_v0  ;;  %2673 = vmatprep.subr.bf16.mxu0 %v3341_v0 }
  0x4c   :  { %444 = vrot.lane.b32.xlu0 %v3456_v13, %s3333_s27  ;;  %2642 = vmatpush3.bf16.msra.mxu1 %v3458_v14 }
  0x4d   :  { %390 = vrot.lane.b32.xlu1 %v2318_v12, %s3343_s2  ;;  %2674 = vmatpush3.bf16.msra.mxu0 %v3458_v14 }
  0x4e   :  { %2643 = vmatprep.subr.bf16.mxu1 %v3341_v0  ;;  %2675 = vmatprep.subr.bf16.mxu0 %v3341_v0 }
  0x50   :  { %491 = vrot.lane.b32.xlu0 %v3440_v9, %s3344_s5  ;;  %2644 = vmatpush3.bf16.msra.mxu1 %v3464_v15 }
  0x51   :  { %493 = vrot.lane.b32.xlu1 %v3456_v13, %s3344_s5  ;;  %2676 = vmatpush3.bf16.msra.mxu0 %v3464_v15 }
  0x52   :  { %2645 = vmatprep.subr.bf16.mxu1 %v3341_v0  ;;  %2677 = vmatprep.subr.bf16.mxu0 %v3341_v0 }
  0x54   :  { %640 = vrot.lane.b32.xlu0 %v3479_v18, %s3333_s27  ;;  %2646 = vmatpush3.bf16.msra.mxu1 %v3473_v17 }
  0x55   :  { %642 = vrot.lane.b32.xlu1 %v3481_v19, %s3333_s27  ;;  %2678 = vmatpush3.bf16.msra.mxu0 %v3473_v17 }
  0x56   :  { %2651 = vmatprep.subr.bf16.mxu1 %v3341_v0  ;;  %2699 = vmatprep.subr.bf16.mxu0 %v3341_v0 }
  0x57   :  { %2648 = vmatmul.mubr.msk.bf16.vlgmr.msra.gmra.mxu1 %vm143_vm1, %v3417_v2 }
  0x58   :  { %588 = vrot.lane.b32.xlu0 %v2325_v21, %s3343_s2  ;;  %2652 = vmatpush3.bf16.msra.mxu1 %v3423_v5 }
  0x59   :  { %2663 = vmatprep.mubr.msk.bf16.mxu1 %vm3342_vm0, %v3341_v0  ;;  %2653 = vmatprep.subr.bf16.mxu1 %v3341_v0 }
  0x5a   :  { %689 = vrot.lane.b32.xlu1 %v3479_v18, %s3344_s5 }
  0x5c   :  { %691 = vrot.lane.b32.xlu0 %v3481_v19, %s3344_s5  ;;  %2654 = vmatpush3.bf16.msra.mxu1 %v3431_v8 }
  0x5d   :  { %2655 = vmatprep.subr.bf16.mxu1 %v3341_v0 }
  0x5e   :  { %786 = vrot.lane.b32.xlu1 %v2332_v23, %s3343_s2 }
  0x60   :  { %945 = vrot.lane.b32.xlu0 %v3419_v3, %s3343_s2  ;;  %2656 = vmatpush3.bf16.msra.mxu1 %v3444_v11 }
  0x61   :  { %2657 = vmatprep.subr.bf16.mxu1 %v3341_v0 }
  0x62   :  { %947 = vrot.lane.b32.xlu1 %v3428_v6, %s3343_s2 }
  0x64   :  { %1118 = vrot.lane.b32.xlu0 %v3440_v9, %s3343_s2  ;;  %2658 = vmatpush3.bf16.msra.mxu1 %v3458_v14 }
  0x65   :  { %2659 = vmatprep.subr.bf16.mxu1 %v3341_v0 }
  0x66   :  { %1120 = vrot.lane.b32.xlu1 %v3456_v13, %s3343_s2 }
  0x68   :  { %1290 = vrot.lane.b32.xlu0 %v3479_v18, %s3343_s2  ;;  %2660 = vmatpush3.bf16.msra.mxu1 %v3464_v15 }
  0x69   :  { %2661 = vmatprep.subr.bf16.mxu1 %v3341_v0 }
  0x6a   :  { %1292 = vrot.lane.b32.xlu1 %v3481_v19, %s3343_s2 }
  0x6c   :  { %2662 = vmatpush3.bf16.msra.mxu1 %v3473_v17 }
  0x6d   :  { %2683 = vmatprep.subr.bf16.mxu1 %v3341_v0 }
  0xb2   :  { %v243_v24 = vpop.permute.xlu0 %242 }
  0xb3   :  { %v191_v25 = vpop.permute.xlu1 %190 }
  0xb4   :  { %2664 = vmatmul.mubr.msk.bf16.vlgmr.msra.gmra.mxu1 %vm143_vm1, %v191_v25 }
  0xb5   :  { %2684 = vmatpush3.bf16.msra.mxu1 %v3423_v5  ;;  %2695 = vmatprep.mubr.msk.bf16.mxu1 %vm3342_vm0, %v3341_v0 }
  0xb6   :  { %2685 = vmatprep.subr.bf16.mxu1 %v3341_v0  ;;  %v3542_v26 = vpop.permute.xlu0 %244 }
  0xb7   :  { %v3546_v27 = vsel %vm246_vm2, %v243_v24, %v3542_v26  ;;  %v293_v29 = vpop.permute.xlu1 %292 }
  0xb8   :  { %2680 = vmatmul.mubr.msk.bf16.vlgmr.msra.gmra.mxu0 %vm143_vm1, %v3546_v27 }
  0xb9   :  { %2686 = vmatpush3.bf16.msra.mxu1 %v3431_v8  ;;  %2700 = vmatpush3.bf16.msra.mxu0 %v3423_v5 }
  0xba   :  { %2687 = vmatprep.subr.bf16.mxu1 %v3341_v0  ;;  %2701 = vmatprep.subr.bf16.mxu0 %v3341_v0  ;;  %v3567_v28 = vpop.permute.xlu0 %294 }
  0xbb   :  { %2711 = vmatprep.mubr.msk.bf16.mxu0 %vm3342_vm0, %v3341_v0  ;;  %v3573_v30 = vsel %vm296_vm3, %v293_v29, %v3567_v28  ;;  %v443_v31 = vpop.permute.xlu1 %442 }
  0xbd   :  { %2688 = vmatpush3.bf16.msra.mxu1 %v3444_v11  ;;  %2702 = vmatpush3.bf16.msra.mxu0 %v3431_v8 }
  0xbe   :  { %2689 = vmatprep.subr.bf16.mxu1 %v3341_v0  ;;  %2703 = vmatprep.subr.bf16.mxu0 %v3341_v0  ;;  %v3610_v33 = vpop.permute.xlu0 %444 }
  0xbf   :  { %v391_v32 = vpop.permute.xlu1 %390  ;;  %v3619_v34 = vsel %vm246_vm2, %v443_v31, %v3610_v33 }
  0xc1   :  { %2690 = vmatpush3.bf16.msra.mxu1 %v3458_v14  ;;  %2704 = vmatpush3.bf16.msra.mxu0 %v3444_v11 }
  0xc2   :  { %2691 = vmatprep.subr.bf16.mxu1 %v3341_v0  ;;  %2705 = vmatprep.subr.bf16.mxu0 %v3341_v0  ;;  %v492_v35 = vpop.permute.xlu0 %491 }
  0xc3   :  { %v3642_v36 = vpop.permute.xlu1 %493 }
  0xc4   :  { %v3648_v37 = vsel %vm296_vm3, %v492_v35, %v3642_v36 }
  0xc5   :  { %2692 = vmatpush3.bf16.msra.mxu1 %v3464_v15  ;;  %2706 = vmatpush3.bf16.msra.mxu0 %v3458_v14 }
  0xc6   :  { %2693 = vmatprep.subr.bf16.mxu1 %v3341_v0  ;;  %2707 = vmatprep.subr.bf16.mxu0 %v3341_v0  ;;  %v641_v38 = vpop.permute.xlu0 %640 }
  0xc7   :  { %v3685_v40 = vpop.permute.xlu1 %642 }
  0xc8   :  { %v3694_v41 = vsel %vm246_vm2, %v641_v38, %v3685_v40 }
  0xc9   :  { %2694 = vmatpush3.bf16.msra.mxu1 %v3473_v17  ;;  %2708 = vmatpush3.bf16.msra.mxu0 %v3464_v15 }
  0xca   :  { %2715 = vmatprep.subr.bf16.mxu1 %v3341_v0  ;;  %2709 = vmatprep.subr.bf16.mxu0 %v3341_v0  ;;  %v589_v39 = vpop.permute.xlu0 %588 }
  0xcc   :  { %2696 = vmatmul.mubr.msk.bf16.vlgmr.msra.gmra.mxu1 %vm143_vm1, %v3573_v30  ;;  %v690_v47 = vpop.permute.xlu1 %689 }
  0xcd   :  { %2716 = vmatpush3.bf16.msra.mxu1 %v3423_v5  ;;  %2727 = vmatprep.mubr.msk.bf16.mxu1 %vm3342_vm0, %v3341_v0 }
  0xce   :  { %2710 = vmatpush3.bf16.msra.mxu0 %v3473_v17  ;;  %2717 = vmatprep.subr.bf16.mxu1 %v3341_v0  ;;  %v3719_v46 = vpop.permute.xlu0 %691 }
  0xcf   :  { %2731 = vmatprep.subr.bf16.mxu0 %v3341_v0  ;;  %v3725_v48 = vsel %vm296_vm3, %v690_v47, %v3719_v46 }
  0xd0   :  { %v787_v54 = vpop.permute.xlu1 %786 }
  0xd1   :  { %2712 = vmatmul.mubr.msk.bf16.vlgmr.msra.gmra.mxu0 %vm143_vm1, %v3442_v10  ;;  %2718 = vmatpush3.bf16.msra.mxu1 %v3431_v8 }
  0xd2   :  { %2732 = vmatpush3.bf16.msra.mxu0 %v3423_v5  ;;  %2719 = vmatprep.subr.bf16.mxu1 %v3341_v0  ;;  %v946_v58 = vpop.permute.xlu0 %945 }
  0xd3   :  { %2733 = vmatprep.subr.bf16.mxu0 %v3341_v0  ;;  %2743 = vmatprep.mubr.msk.bf16.mxu0 %vm3342_vm0, %v3341_v0 }
  0xd4   :  { %v3811_v59 = vpop.permute.xlu1 %947 }
  0xd5   :  { %2720 = vmatpush3.bf16.msra.mxu1 %v3444_v11  ;;  %v3817_v60 = vsel %vm143_vm1, %v946_v58, %v3811_v59 }
  0xd6   :  { %2734 = vmatpush3.bf16.msra.mxu0 %v3431_v8  ;;  %2721 = vmatprep.subr.bf16.mxu1 %v3341_v0  ;;  %v1119_v25 = vpop.permute.xlu0 %1118 }
  0xd7   :  { %2735 = vmatprep.subr.bf16.mxu0 %v3341_v0 }
  0xd8   :  { %v3894_v29 = vpop.permute.xlu1 %1120 }
  0xd9   :  { %2722 = vmatpush3.bf16.msra.mxu1 %v3458_v14  ;;  %v3900_v31 = vsel %vm143_vm1, %v1119_v25, %v3894_v29 }
  0xda   :  { %2736 = vmatpush3.bf16.msra.mxu0 %v3444_v11  ;;  %2723 = vmatprep.subr.bf16.mxu1 %v3341_v0 }
  0xdb   :  { %2737 = vmatprep.subr.bf16.mxu0 %v3341_v0 }
  0xdd   :  { %2724 = vmatpush3.bf16.msra.mxu1 %v3464_v15 }
  0xde   :  { %2738 = vmatpush3.bf16.msra.mxu0 %v3458_v14  ;;  %2725 = vmatprep.subr.bf16.mxu1 %v3341_v0 }
  0xdf   :  { %2739 = vmatprep.subr.bf16.mxu0 %v3341_v0 }
  0xe1   :  { %2726 = vmatpush3.bf16.msra.mxu1 %v3473_v17 }
  0xe2   :  { %2740 = vmatpush3.bf16.msra.mxu0 %v3464_v15  ;;  %2747 = vmatprep.subr.bf16.mxu1 %v3341_v0 }
  0xe3   :  { %2741 = vmatprep.subr.bf16.mxu0 %v3341_v0 }
  0xe4   :  { %2728 = vmatmul.mubr.msk.bf16.vlgmr.msra.gmra.mxu1 %vm143_vm1, %v391_v32 }
  0xe5   :  { %2748 = vmatpush3.bf16.msra.mxu1 %v3423_v5  ;;  %2759 = vmatprep.mubr.msk.bf16.mxu1 %vm3342_vm0, %v3341_v0 }
  0xe6   :  { %2742 = vmatpush3.bf16.msra.mxu0 %v3473_v17  ;;  %2749 = vmatprep.subr.bf16.mxu1 %v3341_v0 }
  0xe7   :  { %2763 = vmatprep.subr.bf16.mxu0 %v3341_v0 }
  0xe9   :  { %2744 = vmatmul.mubr.msk.bf16.vlgmr.msra.gmra.mxu0 %vm143_vm1, %v3619_v34  ;;  %2750 = vmatpush3.bf16.msra.mxu1 %v3431_v8 }
  0xea   :  { %2764 = vmatpush3.bf16.msra.mxu0 %v3423_v5  ;;  %2751 = vmatprep.subr.bf16.mxu1 %v3341_v0 }
  0xeb   :  { %2765 = vmatprep.subr.bf16.mxu0 %v3341_v0  ;;  %2775 = vmatprep.mubr.msk.bf16.mxu0 %vm3342_vm0, %v3341_v0 }
  0xed   :  { %2752 = vmatpush3.bf16.msra.mxu1 %v3444_v11 }
  0xee   :  { %2766 = vmatpush3.bf16.msra.mxu0 %v3431_v8  ;;  %2753 = vmatprep.subr.bf16.mxu1 %v3341_v0 }
  0xef   :  { %2767 = vmatprep.subr.bf16.mxu0 %v3341_v0 }
  0xf1   :  { %2754 = vmatpush3.bf16.msra.mxu1 %v3458_v14 }
  0xf2   :  { %2768 = vmatpush3.bf16.msra.mxu0 %v3444_v11  ;;  %2755 = vmatprep.subr.bf16.mxu1 %v3341_v0 }
  0xf3   :  { %2769 = vmatprep.subr.bf16.mxu0 %v3341_v0 }
  0xf5   :  { %2756 = vmatpush3.bf16.msra.mxu1 %v3464_v15 }
  0xf6   :  { %2770 = vmatpush3.bf16.msra.mxu0 %v3458_v14  ;;  %2757 = vmatprep.subr.bf16.mxu1 %v3341_v0 }
  0xf7   :  { %2771 = vmatprep.subr.bf16.mxu0 %v3341_v0 }
  0xf9   :  { %2758 = vmatpush3.bf16.msra.mxu1 %v3473_v17 }
  0xfa   :  { %2772 = vmatpush3.bf16.msra.mxu0 %v3464_v15  ;;  %2779 = vmatprep.subr.bf16.mxu1 %v3341_v0 }
  0xfb   :  { %2773 = vmatprep.subr.bf16.mxu0 %v3341_v0 }
  0xfc   :  { %2760 = vmatmul.mubr.msk.bf16.vlgmr.msra.gmra.mxu1 %vm143_vm1, %v3648_v37 }
  0xfd   :  { %2780 = vmatpush3.bf16.msra.mxu1 %v3423_v5  ;;  %2791 = vmatprep.mubr.msk.bf16.mxu1 %vm3342_vm0, %v3341_v0 }
  0xfe   :  { %2774 = vmatpush3.bf16.msra.mxu0 %v3473_v17  ;;  %2781 = vmatprep.subr.bf16.mxu1 %v3341_v0 }
  0xff   :  { %2795 = vmatprep.subr.bf16.mxu0 %v3341_v0 }
 0x101   :  { %2776 = vmatmul.mubr.msk.bf16.vlgmr.msra.gmra.mxu0 %vm143_vm1, %v3484_v20  ;;  %2782 = vmatpush3.bf16.msra.mxu1 %v3431_v8 }
 0x102   :  { %2796 = vmatpush3.bf16.msra.mxu0 %v3423_v5  ;;  %2783 = vmatprep.subr.bf16.mxu1 %v3341_v0 }
 0x103   :  { %2797 = vmatprep.subr.bf16.mxu0 %v3341_v0  ;;  %2807 = vmatprep.mubr.msk.bf16.mxu0 %vm3342_vm0, %v3341_v0 }
 0x105   :  { %2784 = vmatpush3.bf16.msra.mxu1 %v3444_v11 }
 0x106   :  { %2798 = vmatpush3.bf16.msra.mxu0 %v3431_v8  ;;  %2785 = vmatprep.subr.bf16.mxu1 %v3341_v0 }
 0x107   :  { %2799 = vmatprep.subr.bf16.mxu0 %v3341_v0 }
 0x109   :  { %2786 = vmatpush3.bf16.msra.mxu1 %v3458_v14 }
 0x10a   :  { %2800 = vmatpush3.bf16.msra.mxu0 %v3444_v11  ;;  %2787 = vmatprep.subr.bf16.mxu1 %v3341_v0 }
 0x10b   :  { %2801 = vmatprep.subr.bf16.mxu0 %v3341_v0 }
 0x10d   :  { %2788 = vmatpush3.bf16.msra.mxu1 %v3464_v15 }
 0x10e   :  { %2802 = vmatpush3.bf16.msra.mxu0 %v3458_v14  ;;  %2789 = vmatprep.subr.bf16.mxu1 %v3341_v0 }
 0x10f   :  { %2803 = vmatprep.subr.bf16.mxu0 %v3341_v0 }
 0x111   :  { %2790 = vmatpush3.bf16.msra.mxu1 %v3473_v17 }
 0x112   :  { %2804 = vmatpush3.bf16.msra.mxu0 %v3464_v15  ;;  %2811 = vmatprep.subr.bf16.mxu1 %v3341_v0 }
 0x113   :  { %2805 = vmatprep.subr.bf16.mxu0 %v3341_v0 }
 0x114   :  { %2792 = vmatmul.mubr.msk.bf16.vlgmr.msra.gmra.mxu1 %vm143_vm1, %v589_v39 }
 0x115   :  { %2812 = vmatpush3.bf16.msra.mxu1 %v3423_v5  ;;  %2823 = vmatprep.mubr.msk.bf16.mxu1 %vm3342_vm0, %v3341_v0 }
 0x116   :  { %2806 = vmatpush3.bf16.msra.mxu0 %v3473_v17  ;;  %2813 = vmatprep.subr.bf16.mxu1 %v3341_v0 }
 0x117   :  { %2827 = vmatprep.subr.bf16.mxu0 %v3341_v0  ;;  %v3701_v42 = vpop.f32.mrf.mxu1 }
 0x119   :  { %2808 = vmatmul.mubr.msk.bf16.vlgmr.msra.gmra.mxu0 %vm143_vm1, %v3694_v41  ;;  %2814 = vmatpush3.bf16.msra.mxu1 %v3431_v8  ;;  %v2649_v43 = vpop.f32.mrf.mxu1 }
 0x11a   :  { %2828 = vmatpush3.bf16.msra.mxu0 %v3423_v5  ;;  %2815 = vmatprep.subr.bf16.mxu1 %v3341_v0 }
 0x11b   :  { %2829 = vmatprep.subr.bf16.mxu0 %v3341_v0  ;;  %2839 = vmatprep.mubr.msk.bf16.mxu0 %vm3342_vm0, %v3341_v0  ;;  %v184_v44 = vpop.f32.mrf.mxu1 }
 0x11d   :  { %2816 = vmatpush3.bf16.msra.mxu1 %v3444_v11  ;;  %v2650_v45 = vpop.f32.mrf.mxu1 }
 0x11e   :  { %2830 = vmatpush3.bf16.msra.mxu0 %v3431_v8  ;;  %2817 = vmatprep.subr.bf16.mxu1 %v3341_v0 }
 0x11f   :  { %2831 = vmatprep.subr.bf16.mxu0 %v3341_v0 }
 0x121   :  { %2818 = vmatpush3.bf16.msra.mxu1 %v3458_v14 }
 0x122   :  { %2832 = vmatpush3.bf16.msra.mxu0 %v3444_v11  ;;  %2819 = vmatprep.subr.bf16.mxu1 %v3341_v0 }
 0x123   :  { %2833 = vmatprep.subr.bf16.mxu0 %v3341_v0 }
 0x125   :  { %2820 = vmatpush3.bf16.msra.mxu1 %v3464_v15 }
 0x126   :  { %2834 = vmatpush3.bf16.msra.mxu0 %v3458_v14  ;;  %2821 = vmatprep.subr.bf16.mxu1 %v3341_v0 }
 0x127   :  { %2835 = vmatprep.subr.bf16.mxu0 %v3341_v0 }
 0x129   :  { %2822 = vmatpush3.bf16.msra.mxu1 %v3473_v17 }
 0x12a   :  { %2836 = vmatpush3.bf16.msra.mxu0 %v3464_v15  ;;  %2843 = vmatprep.subr.bf16.mxu1 %v3341_v0 }
 0x12b   :  { %2837 = vmatprep.subr.bf16.mxu0 %v3341_v0 }
 0x12c   :  { %2824 = vmatmul.mubr.msk.bf16.vlgmr.msra.gmra.mxu1 %vm143_vm1, %v3725_v48 }
 0x12d   :  { %2844 = vmatpush3.bf16.msra.mxu1 %v3423_v5  ;;  %2855 = vmatprep.mubr.msk.bf16.mxu1 %vm3342_vm0, %v3341_v0 }
 0x12e   :  { %2838 = vmatpush3.bf16.msra.mxu0 %v3473_v17  ;;  %2845 = vmatprep.subr.bf16.mxu1 %v3341_v0 }
 0x12f   :  { %2859 = vmatprep.subr.bf16.mxu0 %v3341_v0 }
 0x131   :  { %2840 = vmatmul.mubr.msk.bf16.vlgmr.msra.gmra.mxu0 %vm143_vm1, %v3499_v22  ;;  %2846 = vmatpush3.bf16.msra.mxu1 %v3431_v8 }
 0x132   :  { %2860 = vmatpush3.bf16.msra.mxu0 %v3737_v49  ;;  %2847 = vmatprep.subr.bf16.mxu1 %v3341_v0 }
 0x133   :  { %2861 = vmatprep.subr.bf16.mxu0 %v3341_v0  ;;  %2875 = vmatprep.mubr.msk.bf16.mxu0 %vm3342_vm0, %v3341_v0 }
 0x135   :  { %2848 = vmatpush3.bf16.msra.mxu1 %v3444_v11 }
 0x136   :  { %2862 = vmatpush3.bf16.msra.mxu0 %v3745_v50  ;;  %2849 = vmatprep.subr.bf16.mxu1 %v3341_v0 }
 0x137   :  { %2863 = vmatprep.subr.bf16.mxu0 %v3341_v0 }
 0x139   :  { %2850 = vmatpush3.bf16.msra.mxu1 %v3458_v14 }
 0x13a   :  { %2864 = vmatpush3.bf16.msra.mxu0 %v3753_v51  ;;  %2851 = vmatprep.subr.bf16.mxu1 %v3341_v0 }
 0x13b   :  { %2865 = vmatprep.subr.bf16.mxu0 %v3341_v0 }
 0x13d   :  { %2852 = vmatpush3.bf16.msra.mxu1 %v3464_v15 }
 0x13e   :  { %2866 = vmatpush3.bf16.msra.mxu0 %v3759_v52  ;;  %2853 = vmatprep.subr.bf16.mxu1 %v3341_v0 }
 0x13f   :  { %2867 = vmatprep.subr.bf16.mxu0 %v3341_v0 }
 0x141   :  { %2854 = vmatpush3.bf16.msra.mxu1 %v3473_v17 }
 0x142   :  { %2868 = vmatpush3.bf16.msra.mxu0 %v3765_v53  ;;  %2879 = vmatprep.subr.bf16.mxu1 %v3341_v0 }
 0x143   :  { %2869 = vmatprep.subr.bf16.mxu0 %v3341_v0 }
 0x144   :  { %2856 = vmatmul.mubr.msk.bf16.vlgmr.msra.gmra.mxu1 %vm143_vm1, %v787_v54 }
 0x145   :  { %2880 = vmatpush3.bf16.msra.mxu1 %v3737_v49  ;;  %2895 = vmatprep.mubr.msk.bf16.mxu1 %vm3342_vm0, %v3341_v0 }
 0x146   :  { %2870 = vmatpush3.bf16.msra.mxu0 %v3771_v55  ;;  %2881 = vmatprep.subr.bf16.mxu1 %v3341_v0 }
 0x147   :  { %2871 = vmatprep.subr.bf16.mxu0 %v3341_v0 }
 0x149   :  { %2882 = vmatpush3.bf16.msra.mxu1 %v3745_v50 }
 0x14a   :  { %2872 = vmatpush3.bf16.msra.mxu0 %v3780_v56  ;;  %2883 = vmatprep.subr.bf16.mxu1 %v3341_v0 }
 0x14b   :  { %2873 = vmatprep.subr.bf16.mxu0 %v3341_v0 }
 0x14d   :  { %2884 = vmatpush3.bf16.msra.mxu1 %v3753_v51 }
 0x14e   :  { %2874 = vmatpush3.bf16.msra.mxu0 %v3786_v57  ;;  %2885 = vmatprep.subr.bf16.mxu1 %v3341_v0 }
 0x14f   :  { %2899 = vmatprep.subr.bf16.mxu0 %v3341_v0 }
 0x151   :  { %2876 = vmatmul.mubr.bf16.vlgmr.msra.gmra.mxu0 %v3417_v2  ;;  %2886 = vmatpush3.bf16.msra.mxu1 %v3759_v52 }
 0x152   :  { %2900 = vmatpush3.bf16.msra.mxu0 %v3737_v49  ;;  %2887 = vmatprep.subr.bf16.mxu1 %v3341_v0 }
 0x153   :  { %2901 = vmatprep.subr.bf16.mxu0 %v3341_v0  ;;  %2915 = vmatprep.mubr.msk.bf16.mxu0 %vm3342_vm0, %v3341_v0 }
 0x155   :  { %2888 = vmatpush3.bf16.msra.mxu1 %v3765_v53 }
 0x156   :  { %2902 = vmatpush3.bf16.msra.mxu0 %v3745_v50  ;;  %2889 = vmatprep.subr.bf16.mxu1 %v3341_v0 }
 0x157   :  { %2903 = vmatprep.subr.bf16.mxu0 %v3341_v0 }
 0x159   :  { %2890 = vmatpush3.bf16.msra.mxu1 %v3771_v55 }
 0x15a   :  { %2904 = vmatpush3.bf16.msra.mxu0 %v3753_v51  ;;  %2891 = vmatprep.subr.bf16.mxu1 %v3341_v0 }
 0x15b   :  { %2905 = vmatprep.subr.bf16.mxu0 %v3341_v0 }
 0x15d   :  { %2892 = vmatpush3.bf16.msra.mxu1 %v3780_v56 }
 0x15e   :  { %2906 = vmatpush3.bf16.msra.mxu0 %v3759_v52  ;;  %2893 = vmatprep.subr.bf16.mxu1 %v3341_v0 }
 0x15f   :  { %2907 = vmatprep.subr.bf16.mxu0 %v3341_v0 }
 0x161   :  { %2894 = vmatpush3.bf16.msra.mxu1 %v3786_v57 }
 0x162   :  { %2908 = vmatpush3.bf16.msra.mxu0 %v3765_v53  ;;  %2919 = vmatprep.subr.bf16.mxu1 %v3341_v0 }
 0x163   :  { %2909 = vmatprep.subr.bf16.mxu0 %v3341_v0 }
 0x164   :  { %2896 = vmatmul.mubr.bf16.vlgmr.msra.gmra.mxu1 %v3817_v60 }
 0x165   :  { %2920 = vmatpush3.bf16.msra.mxu1 %v3737_v49  ;;  %2935 = vmatprep.mubr.msk.bf16.mxu1 %vm3342_vm0, %v3341_v0 }
 0x166   :  { %2910 = vmatpush3.bf16.msra.mxu0 %v3771_v55  ;;  %2921 = vmatprep.subr.bf16.mxu1 %v3341_v0 }
 0x167   :  { %2911 = vmatprep.subr.bf16.mxu0 %v3341_v0 }
 0x169   :  { %2922 = vmatpush3.bf16.msra.mxu1 %v3745_v50 }
 0x16a   :  { %2912 = vmatpush3.bf16.msra.mxu0 %v3780_v56  ;;  %2923 = vmatprep.subr.bf16.mxu1 %v3341_v0 }
 0x16b   :  { %2913 = vmatprep.subr.bf16.mxu0 %v3341_v0 }
 0x16d   :  { %2924 = vmatpush3.bf16.msra.mxu1 %v3753_v51 }
 0x16e   :  { %2914 = vmatpush3.bf16.msra.mxu0 %v3786_v57  ;;  %2925 = vmatprep.subr.bf16.mxu1 %v3341_v0 }
 0x16f   :  { %2939 = vmatprep.subr.bf16.mxu0 %v3341_v0 }
 0x171   :  { %2916 = vmatmul.mubr.bf16.vlgmr.msra.gmra.mxu0 %v3546_v27  ;;  %2926 = vmatpush3.bf16.msra.mxu1 %v3759_v52 }
 0x172   :  { %2940 = vmatpush3.bf16.msra.mxu0 %v3737_v49  ;;  %2927 = vmatprep.subr.bf16.mxu1 %v3341_v0 }
 0x173   :  { %2941 = vmatprep.subr.bf16.mxu0 %v3341_v0  ;;  %2955 = vmatprep.mubr.msk.bf16.mxu0 %vm3342_vm0, %v3341_v0 }
 0x174   :  { %v229_v61 = vpop.f32.mrf.mxu1 }
 0x175   :  { %2928 = vmatpush3.bf16.msra.mxu1 %v3765_v53  ;;  %v235_v63 = vmax.f32 %v3701_v42, %v229_v61 }
 0x176   :  { %2942 = vmatpush3.bf16.msra.mxu0 %v3745_v50  ;;  %2929 = vmatprep.subr.bf16.mxu1 %v3341_v0  ;;  %v2665_v62 = vpop.f32.mrf.mxu1 }
 0x177   :  { %2943 = vmatprep.subr.bf16.mxu0 %v3341_v0 }
 0x178   :  { %v232_v1 = vpop.f32.mrf.mxu1  ;;  %v285_v2 = vpop.f32.mrf.mxu0 }
 0x179   :  { %2930 = vmatpush3.bf16.msra.mxu1 %v3771_v55  ;;  %v291_v4 = vmax.f32 %v235_v63, %v285_v2 }
 0x17a   :  { %2944 = vmatpush3.bf16.msra.mxu0 %v3753_v51  ;;  %2931 = vmatprep.subr.bf16.mxu1 %v3341_v0  ;;  %v2666_v5 = vpop.f32.mrf.mxu1  ;;  %v2681_v7 = vpop.f32.mrf.mxu0 }
 0x17b   :  { %2945 = vmatprep.subr.bf16.mxu0 %v3341_v0 }
 0x17c   :  { %v288_v8 = vpop.f32.mrf.mxu0 }
 0x17d   :  { %2932 = vmatpush3.bf16.msra.mxu1 %v3780_v56 }
 0x17e   :  { %2946 = vmatpush3.bf16.msra.mxu0 %v3759_v52  ;;  %2933 = vmatprep.subr.bf16.mxu1 %v3341_v0  ;;  %v2682_v11 = vpop.f32.mrf.mxu0 }
 0x17f   :  { %2947 = vmatprep.subr.bf16.mxu0 %v3341_v0 }
 0x181   :  { %2934 = vmatpush3.bf16.msra.mxu1 %v3786_v57 }
 0x182   :  { %2948 = vmatpush3.bf16.msra.mxu0 %v3765_v53  ;;  %2959 = vmatprep.subr.bf16.mxu1 %v3341_v0 }
 0x183   :  { %2949 = vmatprep.subr.bf16.mxu0 %v3341_v0 }
 0x184   :  { %2936 = vmatmul.mubr.bf16.vlgmr.msra.gmra.mxu1 %v3573_v30 }
 0x185   :  { %2960 = vmatpush3.bf16.msra.mxu1 %v3737_v49  ;;  %2975 = vmatprep.mubr.msk.bf16.mxu1 %vm3342_vm0, %v3341_v0 }
 0x186   :  { %2950 = vmatpush3.bf16.msra.mxu0 %v3771_v55  ;;  %2961 = vmatprep.subr.bf16.mxu1 %v3341_v0 }
 0x187   :  { %2951 = vmatprep.subr.bf16.mxu0 %v3341_v0 }
 0x189   :  { %2962 = vmatpush3.bf16.msra.mxu1 %v3745_v50 }
 0x18a   :  { %2952 = vmatpush3.bf16.msra.mxu0 %v3780_v56  ;;  %2963 = vmatprep.subr.bf16.mxu1 %v3341_v0 }
 0x18b   :  { %2953 = vmatprep.subr.bf16.mxu0 %v3341_v0 }
 0x18c   :  { %v335_v12 = vpop.f32.mrf.mxu1 }
 0x18d   :  { %v341_v14 = vmax.f32 %v291_v4, %v335_v12  ;;  %2964 = vmatpush3.bf16.msra.mxu1 %v3753_v51 }
 0x18e   :  { %2954 = vmatpush3.bf16.msra.mxu0 %v3786_v57  ;;  %2965 = vmatprep.subr.bf16.mxu1 %v3341_v0  ;;  %v2697_v15 = vpop.f32.mrf.mxu1 }
 0x18f   :  { %2979 = vmatprep.subr.bf16.mxu0 %v3341_v0 }
 0x190   :  { %v338_v16 = vpop.f32.mrf.mxu1 }
 0x191   :  { %v380_v17 = vpop.f32.mrf.mxu0  ;;  %2956 = vmatmul.mubr.bf16.vlgmr.msra.gmra.mxu0 %v3442_v10  ;;  %2966 = vmatpush3.bf16.msra.mxu1 %v3759_v52 }
 0x192   :  { %v386_v21 = vmax.f32 %v341_v14, %v380_v17  ;;  %2980 = vmatpush3.bf16.msra.mxu0 %v3737_v49  ;;  %2967 = vmatprep.subr.bf16.mxu1 %v3341_v0  ;;  %v2698_v22 = vpop.f32.mrf.mxu1 }
 0x193   :  { %v2713_v23 = vpop.f32.mrf.mxu0  ;;  %2981 = vmatprep.subr.bf16.mxu0 %v3341_v0  ;;  %2995 = vmatprep.mubr.msk.bf16.mxu0 %vm3342_vm0, %v3341_v0 }
 0x194   :  { %v1291_v23 = vpop.permute.xlu0 %1290 }
 0x195   :  { %v383_v24 = vpop.f32.mrf.mxu0  ;;  %2968 = vmatpush3.bf16.msra.mxu1 %v3765_v53 }
 0x196   :  { %2982 = vmatpush3.bf16.msra.mxu0 %v3745_v50  ;;  %2969 = vmatprep.subr.bf16.mxu1 %v3341_v0  ;;  %v3976_v24 = vpop.permute.xlu1 %1292 }
 0x197   :  { %v2714_v10 = vpop.f32.mrf.mxu0  ;;  %2983 = vmatprep.subr.bf16.mxu0 %v3341_v0  ;;  %v3982_v25 = vsel %vm143_vm1, %v1291_v23, %v3976_v24 }
 0x199   :  { %2970 = vmatpush3.bf16.msra.mxu1 %v3771_v55 }
 0x19a   :  { %2984 = vmatpush3.bf16.msra.mxu0 %v3753_v51  ;;  %2971 = vmatprep.subr.bf16.mxu1 %v3341_v0 }
 0x19b   :  { %2985 = vmatprep.subr.bf16.mxu0 %v3341_v0 }
 0x19d   :  { %2972 = vmatpush3.bf16.msra.mxu1 %v3780_v56 }
 0x19e   :  { %2986 = vmatpush3.bf16.msra.mxu0 %v3759_v52  ;;  %2973 = vmatprep.subr.bf16.mxu1 %v3341_v0 }
 0x19f   :  { %2987 = vmatprep.subr.bf16.mxu0 %v3341_v0 }
 0x1a1   :  { %2974 = vmatpush3.bf16.msra.mxu1 %v3786_v57 }
 0x1a2   :  { %2988 = vmatpush3.bf16.msra.mxu0 %v3765_v53  ;;  %2999 = vmatprep.subr.bf16.mxu1 %v3341_v0 }
 0x1a3   :  { %2989 = vmatprep.subr.bf16.mxu0 %v3341_v0 }
 0x1a4   :  { %v429_v32 = vpop.f32.mrf.mxu1  ;;  %2976 = vmatmul.mubr.bf16.vlgmr.msra.gmra.mxu1 %v3900_v31 }
 0x1a5   :  { %v435_v35 = vmax.f32 %v386_v21, %v429_v32  ;;  %3000 = vmatpush3.bf16.msra.mxu1 %v3737_v49  ;;  %3015 = vmatprep.mubr.msk.bf16.mxu1 %vm3342_vm0, %v3341_v0 }
 0x1a6   :  { %2990 = vmatpush3.bf16.msra.mxu0 %v3771_v55  ;;  %3001 = vmatprep.subr.bf16.mxu1 %v3341_v0  ;;  %v2729_v38 = vpop.f32.mrf.mxu1 }
 0x1a7   :  { %2991 = vmatprep.subr.bf16.mxu0 %v3341_v0 }
 0x1a8   :  { %v432_v39 = vpop.f32.mrf.mxu1 }
 0x1a9   :  { %v484_v42 = vpop.f32.mrf.mxu0  ;;  %3002 = vmatpush3.bf16.msra.mxu1 %v3745_v50 }
 0x1aa   :  { %v490_v43 = vmax.f32 %v435_v35, %v484_v42  ;;  %2992 = vmatpush3.bf16.msra.mxu0 %v3780_v56  ;;  %3003 = vmatprep.subr.bf16.mxu1 %v3341_v0  ;;  %v2730_v44 = vpop.f32.mrf.mxu1 }
 0x1ab   :  { %v2745_v45 = vpop.f32.mrf.mxu0  ;;  %2993 = vmatprep.subr.bf16.mxu0 %v3341_v0 }
 0x1ad   :  { %v487_v47 = vpop.f32.mrf.mxu0  ;;  %3004 = vmatpush3.bf16.msra.mxu1 %v3753_v51 }
 0x1ae   :  { %2994 = vmatpush3.bf16.msra.mxu0 %v3786_v57  ;;  %3005 = vmatprep.subr.bf16.mxu1 %v3341_v0 }
 0x1af   :  { %v2746_v54 = vpop.f32.mrf.mxu0  ;;  %3019 = vmatprep.subr.bf16.mxu0 %v3341_v0 }
 0x1b1   :  { %2996 = vmatmul.mubr.bf16.vlgmr.msra.gmra.mxu0 %v3619_v34  ;;  %3006 = vmatpush3.bf16.msra.mxu1 %v3759_v52 }
 0x1b2   :  { %3020 = vmatpush3.bf16.msra.mxu0 %v3737_v49  ;;  %3007 = vmatprep.subr.bf16.mxu1 %v3341_v0 }
 0x1b3   :  { %3021 = vmatprep.subr.bf16.mxu0 %v3341_v0  ;;  %3035 = vmatprep.mubr.msk.bf16.mxu0 %vm3342_vm0, %v3341_v0 }
 0x1b5   :  { %3008 = vmatpush3.bf16.msra.mxu1 %v3765_v53 }
 0x1b6   :  { %3022 = vmatpush3.bf16.msra.mxu0 %v3745_v50  ;;  %3009 = vmatprep.subr.bf16.mxu1 %v3341_v0 }
 0x1b7   :  { %3023 = vmatprep.subr.bf16.mxu0 %v3341_v0 }
 0x1b9   :  { %3010 = vmatpush3.bf16.msra.mxu1 %v3771_v55 }
 0x1ba   :  { %3024 = vmatpush3.bf16.msra.mxu0 %v3753_v51  ;;  %3011 = vmatprep.subr.bf16.mxu1 %v3341_v0 }
 0x1bb   :  { %3025 = vmatprep.subr.bf16.mxu0 %v3341_v0 }
 0x1bc   :  { %v533_v58 = vpop.f32.mrf.mxu1 }
 0x1bd   :  { %v539_v61 = vmax.f32 %v490_v43, %v533_v58  ;;  %3012 = vmatpush3.bf16.msra.mxu1 %v3780_v56  ;;  %v4035_v58 = vld [vmem:[#allocation8 + $0x30] sm:$0xff]  }
 0x1be   :  { %3026 = vmatpush3.bf16.msra.mxu0 %v3759_v52  ;;  %3013 = vmatprep.subr.bf16.mxu1 %v3341_v0  ;;  %v2761_v62 = vpop.f32.mrf.mxu1 }
 0x1bf   :  { %3027 = vmatprep.subr.bf16.mxu0 %v3341_v0  ;;  %v4043_v62 = vld [vmem:[#allocation8 + $0x28] sm:$0xff]  }
 0x1c0   :  { %v536_v63 = vpop.f32.mrf.mxu1 }
 0x1c1   :  { %v578_v1 = vpop.f32.mrf.mxu0  ;;  %3014 = vmatpush3.bf16.msra.mxu1 %v3786_v57 }
 0x1c2   :  { %v584_v2 = vmax.f32 %v539_v61, %v578_v1  ;;  %3028 = vmatpush3.bf16.msra.mxu0 %v3765_v53  ;;  %3039 = vmatprep.subr.bf16.mxu1 %v3341_v0  ;;  %v2762_v4 = vpop.f32.mrf.mxu1  ;;  %v3203_v1 = vld [vmem:[#allocation2 + $0xc] sm:$0xf] }
 0x1c3   :  { %v2777_v5 = vpop.f32.mrf.mxu0  ;;  %3029 = vmatprep.subr.bf16.mxu0 %v3341_v0  ;;  %v4063_v4 = vld [vmem:[#allocation8 + $0x10] sm:$0xff]  }
 0x1c4   :  { %3016 = vmatmul.mubr.bf16.vlgmr.msra.gmra.mxu1 %v3648_v37 }
 0x1c5   :  { %v581_v7 = vpop.f32.mrf.mxu0  ;;  %3040 = vmatpush3.bf16.msra.mxu1 %v3737_v49  ;;  %3055 = vmatprep.mubr.msk.bf16.mxu1 %vm3342_vm0, %v3341_v0 }
 0x1c6   :  { %3030 = vmatpush3.bf16.msra.mxu0 %v3771_v55  ;;  %3041 = vmatprep.subr.bf16.mxu1 %v3341_v0  ;;  %v4075_v7 = vld [vmem:[#allocation8] sm:$0xff]  }
 0x1c7   :  { %v2778_v8 = vpop.f32.mrf.mxu0  ;;  %3031 = vmatprep.subr.bf16.mxu0 %v3341_v0 }
 0x1c8   :  { %v4081_v8 = vld [vmem:[#allocation8 + $0x48] sm:$0xff]  }
 0x1c9   :  { %3042 = vmatpush3.bf16.msra.mxu1 %v3745_v50 }
 0x1ca   :  { %3032 = vmatpush3.bf16.msra.mxu0 %v3780_v56  ;;  %3043 = vmatprep.subr.bf16.mxu1 %v3341_v0 }
 0x1cb   :  { %3033 = vmatprep.subr.bf16.mxu0 %v3341_v0 }
 0x1cd   :  { %3044 = vmatpush3.bf16.msra.mxu1 %v3753_v51 }
 0x1ce   :  { %3034 = vmatpush3.bf16.msra.mxu0 %v3786_v57  ;;  %3045 = vmatprep.subr.bf16.mxu1 %v3341_v0 }
 0x1cf   :  { %3059 = vmatprep.subr.bf16.mxu0 %v3341_v0 }
 0x1d1   :  { %3036 = vmatmul.mubr.bf16.vlgmr.msra.gmra.mxu0 %v3484_v20  ;;  %3046 = vmatpush3.bf16.msra.mxu1 %v3759_v52 }
 0x1d2   :  { %3060 = vmatpush3.bf16.msra.mxu0 %v3737_v49  ;;  %3047 = vmatprep.subr.bf16.mxu1 %v3341_v0 }
 0x1d3   :  { %3061 = vmatprep.subr.bf16.mxu0 %v3341_v0  ;;  %3075 = vmatprep.mubr.msk.bf16.mxu0 %vm3342_vm0, %v3341_v0 }
 0x1d4   :  { %v627_v11 = vpop.f32.mrf.mxu1 }
 0x1d5   :  { %v633_v12 = vmax.f32 %v584_v2, %v627_v11  ;;  %3048 = vmatpush3.bf16.msra.mxu1 %v3765_v53 }
 0x1d6   :  { %3062 = vmatpush3.bf16.msra.mxu0 %v3745_v50  ;;  %3049 = vmatprep.subr.bf16.mxu1 %v3341_v0  ;;  %v2793_v20 = vpop.f32.mrf.mxu1 }
 0x1d7   :  { %3063 = vmatprep.subr.bf16.mxu0 %v3341_v0  ;;  %v4087_v20 = vld [vmem:[#allocation8 + $0x40] sm:$0xff]  }
 0x1d8   :  { %v630_v14 = vpop.f32.mrf.mxu1 }
 0x1d9   :  { %v682_v15 = vpop.f32.mrf.mxu0  ;;  %3050 = vmatpush3.bf16.msra.mxu1 %v3771_v55 }
 0x1da   :  { %v688_v16 = vmax.f32 %v633_v12, %v682_v15  ;;  %3064 = vmatpush3.bf16.msra.mxu0 %v3753_v51  ;;  %3051 = vmatprep.subr.bf16.mxu1 %v3341_v0  ;;  %v2794_v17 = vpop.f32.mrf.mxu1 }
 0x1db   :  { %v2809_v21 = vpop.f32.mrf.mxu0  ;;  %3065 = vmatprep.subr.bf16.mxu0 %v3341_v0 }
 0x1dd   :  { %v685_v22 = vpop.f32.mrf.mxu0  ;;  %3052 = vmatpush3.bf16.msra.mxu1 %v3780_v56 }
 0x1de   :  { %3066 = vmatpush3.bf16.msra.mxu0 %v3759_v52  ;;  %3053 = vmatprep.subr.bf16.mxu1 %v3341_v0 }
 0x1df   :  { %v2810_v10 = vpop.f32.mrf.mxu0  ;;  %3067 = vmatprep.subr.bf16.mxu0 %v3341_v0 }
 0x1e1   :  { %3054 = vmatpush3.bf16.msra.mxu1 %v3786_v57 }
 0x1e2   :  { %3068 = vmatpush3.bf16.msra.mxu0 %v3765_v53  ;;  %3079 = vmatprep.subr.bf16.mxu1 %v3341_v0 }
 0x1e3   :  { %3069 = vmatprep.subr.bf16.mxu0 %v3341_v0 }
 0x1e4   :  { %3056 = vmatmul.mubr.bf16.vlgmr.msra.gmra.mxu1 %v3982_v25 }
 0x1e5   :  { %3080 = vmatpush3.bf16.msra.mxu1 %v3737_v49  ;;  %3095 = vmatprep.mubr.msk.bf16.mxu1 %vm3342_vm0, %v3341_v0 }
 0x1e6   :  { %3070 = vmatpush3.bf16.msra.mxu0 %v3771_v55  ;;  %3081 = vmatprep.subr.bf16.mxu1 %v3341_v0 }
 0x1e7   :  { %3071 = vmatprep.subr.bf16.mxu0 %v3341_v0 }
 0x1e9   :  { %3082 = vmatpush3.bf16.msra.mxu1 %v3745_v50 }
 0x1ea   :  { %3072 = vmatpush3.bf16.msra.mxu0 %v3780_v56  ;;  %3083 = vmatprep.subr.bf16.mxu1 %v3341_v0 }
 0x1eb   :  { %3073 = vmatprep.subr.bf16.mxu0 %v3341_v0 }
 0x1ec   :  { %v731_v32 = vpop.f32.mrf.mxu1 }
 0x1ed   :  { %v737_v35 = vmax.f32 %v688_v16, %v731_v32  ;;  %3084 = vmatpush3.bf16.msra.mxu1 %v3753_v51 }
 0x1ee   :  { %3074 = vmatpush3.bf16.msra.mxu0 %v3786_v57  ;;  %3085 = vmatprep.subr.bf16.mxu1 %v3341_v0  ;;  %v2825_v38 = vpop.f32.mrf.mxu1 }
 0x1ef   :  { %3099 = vmatprep.subr.bf16.mxu0 %v3341_v0 }
 0x1f0   :  { %v734_v39 = vpop.f32.mrf.mxu1 }
 0x1f1   :  { %v776_v42 = vpop.f32.mrf.mxu0  ;;  %3076 = vmatmul.mubr.bf16.vlgmr.msra.gmra.mxu0 %v3694_v41  ;;  %3086 = vmatpush3.bf16.msra.mxu1 %v3759_v52 }
 0x1f2   :  { %v4004_v43 = vmax.f32 %v737_v35, %v776_v42  ;;  %3100 = vmatpush3.bf16.msra.mxu0 %v3737_v49  ;;  %3087 = vmatprep.subr.bf16.mxu1 %v3341_v0  ;;  %v2826_v44 = vpop.f32.mrf.mxu1  ;;  %v4024_v49 = vld [vmem:[#allocation8 + $0x38] sm:$0xff]  }
 0x1f3   :  { %v2841_v45 = vpop.f32.mrf.mxu0  ;;  %3101 = vmatprep.subr.bf16.mxu0 %v3341_v0  ;;  %3115 = vmatprep.mubr.msk.bf16.mxu0 %vm3342_vm0, %v3341_v0 }
 0x1f5   :  { %v779_v47 = vpop.f32.mrf.mxu0  ;;  %3088 = vmatpush3.bf16.msra.mxu1 %v3765_v53 }
 0x1f6   :  { %3102 = vmatpush3.bf16.msra.mxu0 %v3745_v50  ;;  %3089 = vmatprep.subr.bf16.mxu1 %v3341_v0  ;;  %v3345_v50 = vmov 0  }
 0x1f7   :  { %v2842_v54 = vpop.f32.mrf.mxu0  ;;  %3103 = vmatprep.subr.bf16.mxu0 %v3341_v0 }
 0x1f9   :  { %3090 = vmatpush3.bf16.msra.mxu1 %v3771_v55 }
 0x1fa   :  { %3104 = vmatpush3.bf16.msra.mxu0 %v3753_v51  ;;  %3091 = vmatprep.subr.bf16.mxu1 %v3341_v0 }
 0x1fb   :  { %3105 = vmatprep.subr.bf16.mxu0 %v3341_v0 }
 0x1fd   :  { %3092 = vmatpush3.bf16.msra.mxu1 %v3780_v56 }
 0x1fe   :  { %3106 = vmatpush3.bf16.msra.mxu0 %v3759_v52  ;;  %3093 = vmatprep.subr.bf16.mxu1 %v3341_v0 }
 0x1ff   :  { %3107 = vmatprep.subr.bf16.mxu0 %v3341_v0 }
 0x201   :  { %3094 = vmatpush3.bf16.msra.mxu1 %v3786_v57 }
 0x202   :  { %3108 = vmatpush3.bf16.msra.mxu0 %v3765_v53  ;;  %1556 = vmatprep.subr.bf16.mxu1 %v3345_v50 }
 0x203   :  { %3109 = vmatprep.subr.bf16.mxu0 %v3341_v0 }
 0x204   :  { %v4029_v51 = vpop.f32.mrf.mxu1  ;;  %3096 = vmatmul.mubr.bf16.vlgmr.msra.gmra.mxu1 %v3725_v48 }
 0x205   :  { %v831_v52 = vmax.f32 %v4004_v43, %v4029_v51  ;;  %1557 = vmatpush1.bf16.msra.mxu1 %v4024_v49  ;;  %2354 = vmatprep.mubr.msk.bf16.mxu1 %vm296_vm3, %v3428_v6  ;;  %v4049_v6 = vld [vmem:[#allocation8 + $0x20] sm:$0xff]   ;;  %v2138_v51 = vld [vmem:[#allocation10 + $0x178] sm:$0xff] }
 0x206   :  { %3110 = vmatpush3.bf16.msra.mxu0 %v3771_v55  ;;  %1558 = vmatprep.subr.bf16.mxu1 %v3345_v50  ;;  %v2857_v53 = vpop.f32.mrf.mxu1 }
 0x207   :  { %3111 = vmatprep.subr.bf16.mxu0 %v3341_v0 }
 0x208   :  { %v828_v61 = vpop.f32.mrf.mxu1 }
 0x209   :  { %1559 = vmatpush1.bf16.msra.mxu1 %v4035_v58 }
 0x20a   :  { %3112 = vmatpush3.bf16.msra.mxu0 %v3780_v56  ;;  %1560 = vmatprep.subr.bf16.mxu1 %v3345_v50  ;;  %v2858_v63 = vpop.f32.mrf.mxu1  ;;  %v4055_v56 = vld [vmem:[#allocation8 + $0x18] sm:$0xff]  }
 0x20b   :  { %3113 = vmatprep.subr.bf16.mxu0 %v3341_v0 }
 0x20d   :  { %1561 = vmatpush1.bf16.msra.mxu1 %v4043_v62 }
 0x20e   :  { %3114 = vmatpush3.bf16.msra.mxu0 %v3786_v57  ;;  %1562 = vmatprep.subr.bf16.mxu1 %v3345_v50 }
 0x20f   :  { %1599 = vmatprep.subr.bf16.mxu0 %v3345_v50 }
 0x211   :  { %v939_v55 = vpop.f32.mrf.mxu0  ;;  %3116 = vmatmul.mubr.bf16.vlgmr.msra.gmra.mxu0 %v3203_v1  ;;  %1563 = vmatpush1.bf16.msra.mxu1 %v4049_v6 }
 0x212   :  { %1600 = vmatpush1.bf16.msra.mxu0 %v4024_v49  ;;  %2355 = vmatprep.mubr.msk.bf16.mxu0 %vm296_vm3, %v3811_v59  ;;  %v4069_v59 = vld [vmem:[#allocation8 + $0x8] sm:$0xff]  }
 0x213   :  { %v2877_v2 = vpop.f32.mrf.mxu0  ;;  %1564 = vmatprep.subr.bf16.mxu1 %v3345_v50  ;;  %1601 = vmatprep.subr.bf16.mxu0 %v3345_v50 }
 0x215   :  { %v942_v57 = vpop.f32.mrf.mxu0  ;;  %1565 = vmatpush1.bf16.msra.mxu1 %v4055_v56 }
 0x216   :  { %1602 = vmatpush1.bf16.msra.mxu0 %v4035_v58  ;;  %1566 = vmatprep.subr.bf16.mxu1 %v3345_v50 }
 0x217   :  { %v2878_v5 = vpop.f32.mrf.mxu0  ;;  %1603 = vmatprep.subr.bf16.mxu0 %v3345_v50 }
 0x219   :  { %1567 = vmatpush1.bf16.msra.mxu1 %v4063_v4 }
 0x21a   :  { %1604 = vmatpush1.bf16.msra.mxu0 %v4043_v62  ;;  %1568 = vmatprep.subr.bf16.mxu1 %v3345_v50 }
 0x21b   :  { %1605 = vmatprep.subr.bf16.mxu0 %v3345_v50 }
 0x21d   :  { %1569 = vmatpush1.bf16.msra.mxu1 %v4069_v59 }
 0x21e   :  { %1606 = vmatpush1.bf16.msra.mxu0 %v4049_v6  ;;  %1570 = vmatprep.subr.bf16.mxu1 %v3345_v50 }
 0x21f   :  { %1607 = vmatprep.subr.bf16.mxu0 %v3345_v50 }
 0x221   :  { %1571 = vmatpush1.bf16.msra.mxu1 %v4075_v7 }
 0x222   :  { %1608 = vmatpush1.bf16.msra.mxu0 %v4055_v56  ;;  %1584 = vmatprep.subr.bf16.mxu1 %v3345_v50 }
 0x223   :  { %1609 = vmatprep.subr.bf16.mxu0 %v3345_v50 }
 0x224   :  { %v986_v11 = vpop.f32.mrf.mxu1 }
 0x225   :  { %v992_v12 = vmax.f32 %v939_v55, %v986_v11  ;;  %1585 = vmatpush2.bf16.msra.mxu1 %v4081_v8 }
 0x226   :  { %1610 = vmatpush1.bf16.msra.mxu0 %v4063_v4  ;;  %1586 = vmatprep.subr.bf16.mxu1 %v3345_v50  ;;  %v2897_v14 = vpop.f32.mrf.mxu1 }
 0x227   :  { %1611 = vmatprep.subr.bf16.mxu0 %v3345_v50 }
 0x228   :  { %v989_v15 = vpop.f32.mrf.mxu1 }
 0x229   :  { %1587 = vmatpush2.bf16.msra.mxu1 %v4087_v20 }
 0x22a   :  { %1612 = vmatpush1.bf16.msra.mxu0 %v4069_v59  ;;  %1643 = vmatprep.subr.bf16.mxu1 %v3345_v50  ;;  %v2898_v16 = vpop.f32.mrf.mxu1 }
 0x22b   :  { %1613 = vmatprep.subr.bf16.mxu0 %v3345_v50 }
 0x22c   :  { %1589 = vmatmul.mubr.bf16.vlgmr.msra.gmra.mxu1 %v3419_v3 }
 0x22d   :  { %1644 = vmatpush1.bf16.msra.mxu1 %v4024_v49  ;;  %2356 = vmatprep.mubr.msk.bf16.mxu1 %vm296_vm3, %v3542_v26 }
 0x22e   :  { %1614 = vmatpush1.bf16.msra.mxu0 %v4075_v7  ;;  %1645 = vmatprep.subr.bf16.mxu1 %v3345_v50 }
 0x22f   :  { %1627 = vmatprep.subr.bf16.mxu0 %v3345_v50 }
 0x231   :  { %v1028_v17 = vpop.f32.mrf.mxu0  ;;  %1646 = vmatpush1.bf16.msra.mxu1 %v4035_v58 }
 0x232   :  { %v1034_v21 = vmax.f32 %v992_v12, %v1028_v17  ;;  %1628 = vmatpush2.bf16.msra.mxu0 %v4081_v8  ;;  %1647 = vmatprep.subr.bf16.mxu1 %v3345_v50 }
 0x233   :  { %v2917_v3 = vpop.f32.mrf.mxu0  ;;  %1629 = vmatprep.subr.bf16.mxu0 %v3345_v50 }
 0x235   :  { %v1031_v22 = vpop.f32.mrf.mxu0  ;;  %1648 = vmatpush1.bf16.msra.mxu1 %v4043_v62 }
 0x236   :  { %1630 = vmatpush2.bf16.msra.mxu0 %v4087_v20  ;;  %1649 = vmatprep.subr.bf16.mxu1 %v3345_v50 }
 0x237   :  { %v2918_v26 = vpop.f32.mrf.mxu0  ;;  %1687 = vmatprep.subr.bf16.mxu0 %v3345_v50 }
 0x239   :  { %1632 = vmatmul.mubr.bf16.vlgmr.msra.gmra.mxu0 %v3817_v60  ;;  %1650 = vmatpush1.bf16.msra.mxu1 %v4049_v6 }
 0x23a   :  { %1688 = vmatpush1.bf16.msra.mxu0 %v4024_v49  ;;  %2357 = vmatprep.mubr.msk.bf16.mxu0 %vm296_vm3, %v3567_v28 }
 0x23b   :  { %1651 = vmatprep.subr.bf16.mxu1 %v3345_v50  ;;  %1689 = vmatprep.subr.bf16.mxu0 %v3345_v50 }
 0x23d   :  { %1652 = vmatpush1.bf16.msra.mxu1 %v4055_v56 }
 0x23e   :  { %1690 = vmatpush1.bf16.msra.mxu0 %v4035_v58  ;;  %1653 = vmatprep.subr.bf16.mxu1 %v3345_v50 }
 0x23f   :  { %1691 = vmatprep.subr.bf16.mxu0 %v3345_v50 }
 0x241   :  { %1654 = vmatpush1.bf16.msra.mxu1 %v4063_v4 }
 0x242   :  { %1692 = vmatpush1.bf16.msra.mxu0 %v4043_v62  ;;  %1655 = vmatprep.subr.bf16.mxu1 %v3345_v50 }
 0x243   :  { %1693 = vmatprep.subr.bf16.mxu0 %v3345_v50 }
 0x244   :  { %v1070_v28 = vpop.f32.mrf.mxu1 }
 0x245   :  { %v1076_v60 = vmax.f32 %v1034_v21, %v1070_v28  ;;  %1656 = vmatpush1.bf16.msra.mxu1 %v4069_v59 }
 0x246   :  { %v2937_v23 = vpop.f32.mrf.mxu1  ;;  %1694 = vmatpush1.bf16.msra.mxu0 %v4049_v6  ;;  %1657 = vmatprep.subr.bf16.mxu1 %v3345_v50 }
 0x247   :  { %1695 = vmatprep.subr.bf16.mxu0 %v3345_v50 }
 0x248   :  { %v1073_v10 = vpop.f32.mrf.mxu1 }
 0x249   :  { %1658 = vmatpush1.bf16.msra.mxu1 %v4075_v7 }
 0x24a   :  { %v2938_v32 = vpop.f32.mrf.mxu1  ;;  %1696 = vmatpush1.bf16.msra.mxu0 %v4055_v56  ;;  %1671 = vmatprep.subr.bf16.mxu1 %v3345_v50 }
 0x24b   :  { %1697 = vmatprep.subr.bf16.mxu0 %v3345_v50  ;;  %v2106_v32 = vld [vmem:[#allocation10 + $0x78] sm:$0xff] }
 0x24d   :  { %1672 = vmatpush2.bf16.msra.mxu1 %v4081_v8 }
 0x24e   :  { %1698 = vmatpush1.bf16.msra.mxu0 %v4063_v4  ;;  %1673 = vmatprep.subr.bf16.mxu1 %v3345_v50 }
 0x24f   :  { %1699 = vmatprep.subr.bf16.mxu0 %v3345_v50 }
 0x251   :  { %v1111_v35 = vpop.f32.mrf.mxu0  ;;  %1674 = vmatpush2.bf16.msra.mxu1 %v4087_v20 }
 0x252   :  { %v1117_v38 = vmax.f32 %v1076_v60, %v1111_v35  ;;  %1700 = vmatpush1.bf16.msra.mxu0 %v4069_v59  ;;  %1732 = vmatprep.subr.bf16.mxu1 %v3345_v50 }
 0x253   :  { %v2957_v39 = vpop.f32.mrf.mxu0  ;;  %1701 = vmatprep.subr.bf16.mxu0 %v3345_v50 }
 0x254   :  { %1676 = vmatmul.mubr.bf16.vlgmr.msra.gmra.mxu1 %v3546_v27  ;;  %v2121_v39 = vld [vmem:[#allocation10 + $0xf0] sm:$0xff] }
 0x255   :  { %v1114_v42 = vpop.f32.mrf.mxu0  ;;  %1733 = vmatpush1.bf16.msra.mxu1 %v4024_v49  ;;  %2358 = vmatprep.mubr.msk.bf16.mxu1 %vm296_vm3, %v3456_v13 }
 0x256   :  { %1702 = vmatpush1.bf16.msra.mxu0 %v4075_v7  ;;  %1734 = vmatprep.subr.bf16.mxu1 %v3345_v50  ;;  %v2120_v42 = vld [vmem:[#allocation10 + $0xe8] sm:$0xff] }
 0x257   :  { %v2958_v44 = vpop.f32.mrf.mxu0  ;;  %1715 = vmatprep.subr.bf16.mxu0 %v3345_v50 }
 0x258   :  { %v2104_v44 = vld [vmem:[#allocation10 + $0x68] sm:$0xff] }
 0x259   :  { %1735 = vmatpush1.bf16.msra.mxu1 %v4035_v58 }
 0x25a   :  { %1716 = vmatpush2.bf16.msra.mxu0 %v4081_v8  ;;  %1736 = vmatprep.subr.bf16.mxu1 %v3345_v50 }
 0x25b   :  { %1717 = vmatprep.subr.bf16.mxu0 %v3345_v50 }
 0x25d   :  { %1737 = vmatpush1.bf16.msra.mxu1 %v4043_v62 }
 0x25e   :  { %1718 = vmatpush2.bf16.msra.mxu0 %v4087_v20  ;;  %1738 = vmatprep.subr.bf16.mxu1 %v3345_v50 }
 0x25f   :  { %1776 = vmatprep.subr.bf16.mxu0 %v3345_v50 }
 0x261   :  { %1720 = vmatmul.mubr.bf16.vlgmr.msra.gmra.mxu0 %v3573_v30  ;;  %1739 = vmatpush1.bf16.msra.mxu1 %v4049_v6 }
 0x262   :  { %1777 = vmatpush1.bf16.msra.mxu0 %v4024_v49  ;;  %2359 = vmatprep.mubr.msk.bf16.mxu0 %vm296_vm3, %v3894_v29 }
 0x263   :  { %1740 = vmatprep.subr.bf16.mxu1 %v3345_v50  ;;  %1778 = vmatprep.subr.bf16.mxu0 %v3345_v50 }
 0x264   :  { %v1158_v13 = vpop.f32.mrf.mxu1 }
 0x265   :  { %v1164_v27 = vmax.f32 %v1117_v38, %v1158_v13  ;;  %1741 = vmatpush1.bf16.msra.mxu1 %v4055_v56  ;;  %v2103_v13 = vld [vmem:[#allocation10 + $0x60] sm:$0xff] }
 0x266   :  { %1779 = vmatpush1.bf16.msra.mxu0 %v4035_v58  ;;  %1742 = vmatprep.subr.bf16.mxu1 %v3345_v50  ;;  %v2977_v30 = vpop.f32.mrf.mxu1 }
 0x267   :  { %1780 = vmatprep.subr.bf16.mxu0 %v3345_v50  ;;  %v2118_v30 = vld [vmem:[#allocation10 + $0xd8] sm:$0xff] }
 0x268   :  { %v1161_v45 = vpop.f32.mrf.mxu1 }
 0x269   :  { %1743 = vmatpush1.bf16.msra.mxu1 %v4063_v4  ;;  %v2102_v45 = vld [vmem:[#allocation10 + $0x58] sm:$0xff] }
 0x26a   :  { %1781 = vmatpush1.bf16.msra.mxu0 %v4043_v62  ;;  %1744 = vmatprep.subr.bf16.mxu1 %v3345_v50  ;;  %v2978_v29 = vpop.f32.mrf.mxu1 }
 0x26b   :  { %1782 = vmatprep.subr.bf16.mxu0 %v3345_v50  ;;  %v2117_v29 = vld [vmem:[#allocation10 + $0xd0] sm:$0xff] }
 0x26d   :  { %1745 = vmatpush1.bf16.msra.mxu1 %v4069_v59 }
 0x26e   :  { %1783 = vmatpush1.bf16.msra.mxu0 %v4049_v6  ;;  %1746 = vmatprep.subr.bf16.mxu1 %v3345_v50 }
 0x26f   :  { %1784 = vmatprep.subr.bf16.mxu0 %v3345_v50 }
 0x271   :  { %v1200_v47 = vpop.f32.mrf.mxu0  ;;  %1747 = vmatpush1.bf16.msra.mxu1 %v4075_v7 }
 0x272   :  { %v1206_v54 = vmax.f32 %v1164_v27, %v1200_v47  ;;  %1785 = vmatpush1.bf16.msra.mxu0 %v4055_v56  ;;  %1760 = vmatprep.subr.bf16.mxu1 %v3345_v50  ;;  %v2101_v47 = vld [vmem:[#allocation10 + $0x50] sm:$0xff] }
 0x273   :  { %v2997_v53 = vpop.f32.mrf.mxu0  ;;  %1786 = vmatprep.subr.bf16.mxu0 %v3345_v50 }
 0x274   :  { %v2116_v53 = vld [vmem:[#allocation10 + $0xc8] sm:$0xff] }
 0x275   :  { %v1203_v61 = vpop.f32.mrf.mxu0  ;;  %1761 = vmatpush2.bf16.msra.mxu1 %v4081_v8 }
 0x276   :  { %1787 = vmatpush1.bf16.msra.mxu0 %v4063_v4  ;;  %1762 = vmatprep.subr.bf16.mxu1 %v3345_v50  ;;  %v2100_v61 = vld [vmem:[#allocation10 + $0x48] sm:$0xff] }
 0x277   :  { %v2998_v63 = vpop.f32.mrf.mxu0  ;;  %1788 = vmatprep.subr.bf16.mxu0 %v3345_v50 }
 0x279   :  { %1763 = vmatpush2.bf16.msra.mxu1 %v4087_v20 }
 0x27a   :  { %1789 = vmatpush1.bf16.msra.mxu0 %v4069_v59  ;;  %1820 = vmatprep.subr.bf16.mxu1 %v3345_v50 }
 0x27b   :  { %1790 = vmatprep.subr.bf16.mxu0 %v3345_v50 }
 0x27c   :  { %1765 = vmatmul.mubr.bf16.vlgmr.msra.gmra.mxu1 %v3440_v9 }
 0x27d   :  { %1821 = vmatpush1.bf16.msra.mxu1 %v4024_v49  ;;  %2360 = vmatprep.mubr.msk.bf16.mxu1 %vm296_vm3, %v3610_v33 }
 0x27e   :  { %1791 = vmatpush1.bf16.msra.mxu0 %v4075_v7  ;;  %1822 = vmatprep.subr.bf16.mxu1 %v3345_v50 }
 0x27f   :  { %1804 = vmatprep.subr.bf16.mxu0 %v3345_v50 }
 0x281   :  { %1823 = vmatpush1.bf16.msra.mxu1 %v4035_v58 }
 0x282   :  { %1805 = vmatpush2.bf16.msra.mxu0 %v4081_v8  ;;  %1824 = vmatprep.subr.bf16.mxu1 %v3345_v50 }
 0x283   :  { %1806 = vmatprep.subr.bf16.mxu0 %v3345_v50 }
 0x284   :  { %v1242_v9 = vpop.f32.mrf.mxu1 }
 0x285   :  { %v1248_v55 = vmax.f32 %v1206_v54, %v1242_v9  ;;  %1825 = vmatpush1.bf16.msra.mxu1 %v4043_v62  ;;  %v2115_v9 = vld [vmem:[#allocation10 + $0xc0] sm:$0xff] }
 0x286   :  { %v3017_v1 = vpop.f32.mrf.mxu1  ;;  %1807 = vmatpush2.bf16.msra.mxu0 %v4087_v20  ;;  %1826 = vmatprep.subr.bf16.mxu1 %v3345_v50 }
 0x287   :  { %1864 = vmatprep.subr.bf16.mxu0 %v3345_v50  ;;  %v2097_v1 = vld [vmem:[#allocation10 + $0x30] sm:$0xff] }
 0x288   :  { %v1245_v33 = vpop.f32.mrf.mxu1 }
 0x289   :  { %1809 = vmatmul.mubr.bf16.vlgmr.msra.gmra.mxu0 %v3900_v31  ;;  %1827 = vmatpush1.bf16.msra.mxu1 %v4049_v6  ;;  %v2112_v33 = vld [vmem:[#allocation10 + $0xa8] sm:$0xff] }
 0x28a   :  { %v3018_v2 = vpop.f32.mrf.mxu1  ;;  %1865 = vmatpush1.bf16.msra.mxu0 %v4024_v49  ;;  %2361 = vmatprep.mubr.msk.bf16.mxu0 %vm296_vm3, %v3642_v36 }
 0x28b   :  { %1828 = vmatprep.subr.bf16.mxu1 %v3345_v50  ;;  %1866 = vmatprep.subr.bf16.mxu0 %v3345_v50  ;;  %v2096_v2 = vld [vmem:[#allocation10 + $0x28] sm:$0xff] }
 0x28d   :  { %1829 = vmatpush1.bf16.msra.mxu1 %v4055_v56 }
 0x28e   :  { %1867 = vmatpush1.bf16.msra.mxu0 %v4035_v58  ;;  %1830 = vmatprep.subr.bf16.mxu1 %v3345_v50 }
 0x28f   :  { %1868 = vmatprep.subr.bf16.mxu0 %v3345_v50 }
 0x291   :  { %v1283_v31 = vpop.f32.mrf.mxu0  ;;  %1831 = vmatpush1.bf16.msra.mxu1 %v4063_v4 }
 0x292   :  { %v4215_v57 = vmax.f32 %v1248_v55, %v1283_v31  ;;  %1869 = vmatpush1.bf16.msra.mxu0 %v4043_v62  ;;  %1832 = vmatprep.subr.bf16.mxu1 %v3345_v50  ;;  %v2098_v55 = vld [vmem:[#allocation10 + $0x38] sm:$0xff]  ;;  %v2111_v31 = vld [vmem:[#allocation10 + $0xa0] sm:$0xff] }
 0x293   :  { %v3037_v36 = vpop.f32.mrf.mxu0  ;;  %1870 = vmatprep.subr.bf16.mxu0 %v3345_v50 }
 0x294   :  { %v2094_v36 = vld [vmem:[#allocation10 + $0x18] sm:$0xff] }
 0x295   :  { %v1286_v5 = vpop.f32.mrf.mxu0  ;;  %1833 = vmatpush1.bf16.msra.mxu1 %v4069_v59 }
 0x296   :  { %1871 = vmatpush1.bf16.msra.mxu0 %v4049_v6  ;;  %1834 = vmatprep.subr.bf16.mxu1 %v3345_v50  ;;  %v2334_v5 = vld [vmem:[%s4393_s4] ss:$0 sm:$0xff] }
 0x297   :  { %v3038_v11 = vpop.f32.mrf.mxu0  ;;  %1872 = vmatprep.subr.bf16.mxu0 %v3345_v50 }
 0x298   :  { %v2109_v11 = vld [vmem:[#allocation10 + $0x90] sm:$0xff] }
 0x299   :  { %1835 = vmatpush1.bf16.msra.mxu1 %v4075_v7 }
 0x29a   :  { %1873 = vmatpush1.bf16.msra.mxu0 %v4055_v56  ;;  %1848 = vmatprep.subr.bf16.mxu1 %v3345_v50 }
 0x29b   :  { %1874 = vmatprep.subr.bf16.mxu0 %v3345_v50 }
 0x29d   :  { %1849 = vmatpush2.bf16.msra.mxu1 %v4081_v8 }
 0x29e   :  { %1875 = vmatpush1.bf16.msra.mxu0 %v4063_v4  ;;  %1850 = vmatprep.subr.bf16.mxu1 %v3345_v50 }
 0x29f   :  { %1876 = vmatprep.subr.bf16.mxu0 %v3345_v50 }
 0x2a1   :  { %1851 = vmatpush2.bf16.msra.mxu1 %v4087_v20 }
 0x2a2   :  { %1877 = vmatpush1.bf16.msra.mxu0 %v4069_v59  ;;  %1909 = vmatprep.subr.bf16.mxu1 %v3345_v50 }
 0x2a3   :  { %1878 = vmatprep.subr.bf16.mxu0 %v3345_v50 }
 0x2a4   :  { %v4236_v12 = vpop.f32.mrf.mxu1  ;;  %1853 = vmatmul.mubr.bf16.vlgmr.msra.gmra.mxu1 %v3619_v34 }
 0x2a5   :  { %v1336_v14 = vmax.f32 %v4215_v57, %v4236_v12  ;;  %1910 = vmatpush1.bf16.msra.mxu1 %v4024_v49  ;;  %2362 = vmatprep.mubr.msk.bf16.mxu1 %vm296_vm3, %v3481_v19  ;;  %v2095_v57 = vld [vmem:[#allocation10 + $0x20] sm:$0xff]  ;;  %v2093_v12 = vld [vmem:[#allocation10 + $0x10] sm:$0xff] }
 0x2a6   :  { %1879 = vmatpush1.bf16.msra.mxu0 %v4075_v7  ;;  %1911 = vmatprep.subr.bf16.mxu1 %v3345_v50  ;;  %v3057_v15 = vpop.f32.mrf.mxu1 }
 0x2a7   :  { %1892 = vmatprep.subr.bf16.mxu0 %v3345_v50  ;;  %v839_v15 = vadd.f32 %v2334_v5, %v831_v52  ;;  %v2137_v52 = vld [vmem:[#allocation10 + $0x170] sm:$0xff] }
 0x2a8   :  { %v1333_v16 = vpop.f32.mrf.mxu1 }
 0x2a9   :  { %1912 = vmatpush1.bf16.msra.mxu1 %v4035_v58  ;;  %v2092_v16 = vld [vmem:[#allocation10 + $0x8] sm:$0xff] }
 0x2aa   :  { %1893 = vmatpush2.bf16.msra.mxu0 %v4081_v8  ;;  %1913 = vmatprep.subr.bf16.mxu1 %v3345_v50  ;;  %v3058_v34 = vpop.f32.mrf.mxu1 }
 0x2ab   :  { %1894 = vmatprep.subr.bf16.mxu0 %v3345_v50  ;;  %v2107_v34 = vld [vmem:[#allocation10 + $0x80] sm:$0xff] }
 0x2ad   :  { %1914 = vmatpush1.bf16.msra.mxu1 %v4043_v62 }
 0x2ae   :  { %1895 = vmatpush2.bf16.msra.mxu0 %v4087_v20  ;;  %1915 = vmatprep.subr.bf16.mxu1 %v3345_v50 }
 0x2af   :  { %1953 = vmatprep.subr.bf16.mxu0 %v3345_v50 }
 0x2b1   :  { %v4255_v19 = vpop.f32.mrf.mxu0  ;;  %1897 = vmatmul.mubr.bf16.vlgmr.msra.gmra.mxu0 %v3648_v37  ;;  %1916 = vmatpush1.bf16.msra.mxu1 %v4049_v6 }
 0x2b2   :  { %1954 = vmatpush1.bf16.msra.mxu0 %v4024_v49  ;;  %2363 = vmatprep.mubr.msk.bf16.mxu0 %vm296_vm3, %v3976_v24 }
 0x2b3   :  { %v3077_v17 = vpop.f32.mrf.mxu0  ;;  %1917 = vmatprep.subr.bf16.mxu1 %v3345_v50  ;;  %1955 = vmatprep.subr.bf16.mxu0 %v3345_v50 }
 0x2b4   :  { %v840_v17 = vmax.f32 %v839_v15, 0.0 }
 0x2b5   :  { %v1375_v21 = vpop.f32.mrf.mxu0  ;;  %1918 = vmatpush1.bf16.msra.mxu1 %v4055_v56 }
 0x2b6   :  { %1956 = vmatpush1.bf16.msra.mxu0 %v4035_v58  ;;  %1919 = vmatprep.subr.bf16.mxu1 %v3345_v50 }
 0x2b7   :  { %v3078_v37 = vpop.f32.mrf.mxu0  ;;  %1957 = vmatprep.subr.bf16.mxu0 %v3345_v50 }
 0x2b9   :  { %1920 = vmatpush1.bf16.msra.mxu1 %v4063_v4 }
 0x2ba   :  { %1958 = vmatpush1.bf16.msra.mxu0 %v4043_v62  ;;  %1921 = vmatprep.subr.bf16.mxu1 %v3345_v50 }
 0x2bb   :  { %1959 = vmatprep.subr.bf16.mxu0 %v3345_v50 }
 0x2bd   :  { %1922 = vmatpush1.bf16.msra.mxu1 %v4069_v59 }
 0x2be   :  { %1960 = vmatpush1.bf16.msra.mxu0 %v4049_v6  ;;  %1923 = vmatprep.subr.bf16.mxu1 %v3345_v50 }
 0x2bf   :  { %1961 = vmatprep.subr.bf16.mxu0 %v3345_v50 }
 0x2c1   :  { %1924 = vmatpush1.bf16.msra.mxu1 %v4075_v7 }
 0x2c2   :  { %1962 = vmatpush1.bf16.msra.mxu0 %v4055_v56  ;;  %1937 = vmatprep.subr.bf16.mxu1 %v3345_v50 }
 0x2c3   :  { %1963 = vmatprep.subr.bf16.mxu0 %v3345_v50 }
 0x2c4   :  { %v1414_v24 = vpop.f32.mrf.mxu1 }
 0x2c5   :  { %1938 = vmatpush2.bf16.msra.mxu1 %v4081_v8 }
 0x2c6   :  { %v3097_v3 = vpop.f32.mrf.mxu1  ;;  %1964 = vmatpush1.bf16.msra.mxu0 %v4063_v4  ;;  %1939 = vmatprep.subr.bf16.mxu1 %v3345_v50 }
 0x2c7   :  { %1965 = vmatprep.subr.bf16.mxu0 %v3345_v50 }
 0x2c8   :  { %v1417_v22 = vpop.f32.mrf.mxu1 }
 0x2c9   :  { %1940 = vmatpush2.bf16.msra.mxu1 %v4087_v20 }
 0x2ca   :  { %v3098_v26 = vpop.f32.mrf.mxu1  ;;  %1966 = vmatpush1.bf16.msra.mxu0 %v4069_v59  ;;  %1997 = vmatprep.subr.bf16.mxu1 %v3345_v50 }
 0x2cb   :  { %1967 = vmatprep.subr.bf16.mxu0 %v3345_v50  ;;  %v2136_v26 = vld [vmem:[#allocation10 + $0x168] sm:$0xff] }
 0x2cc   :  { %1942 = vmatmul.mubr.bf16.vlgmr.msra.gmra.mxu1 %v3479_v18 }
 0x2cd   :  { %1998 = vmatpush1.bf16.msra.mxu1 %v4024_v49  ;;  %2364 = vmatprep.mubr.msk.bf16.mxu1 %vm296_vm3, %v3685_v40 }
 0x2ce   :  { %1968 = vmatpush1.bf16.msra.mxu0 %v4075_v7  ;;  %1999 = vmatprep.subr.bf16.mxu1 %v3345_v50 }
 0x2cf   :  { %1981 = vmatprep.subr.bf16.mxu0 %v3345_v50 }
 0x2d1   :  { %v1455_v28 = vpop.f32.mrf.mxu0  ;;  %2000 = vmatpush1.bf16.msra.mxu1 %v4035_v58 }
 0x2d2   :  { %1982 = vmatpush2.bf16.msra.mxu0 %v4081_v8  ;;  %2001 = vmatprep.subr.bf16.mxu1 %v3345_v50 }
 0x2d3   :  { %v3117_v60 = vpop.f32.mrf.mxu0  ;;  %1983 = vmatprep.subr.bf16.mxu0 %v3345_v50 }
 0x2d5   :  { %v1458_v18 = vpop.f32.mrf.mxu0  ;;  %2002 = vmatpush1.bf16.msra.mxu1 %v4043_v62 }
 0x2d6   :  { %1984 = vmatpush2.bf16.msra.mxu0 %v4087_v20  ;;  %2003 = vmatprep.subr.bf16.mxu1 %v3345_v50  ;;  %v2135_v18 = vld [vmem:[#allocation10 + $0x160] sm:$0xff] }
 0x2d7   :  { %v3118_v40 = vpop.f32.mrf.mxu0  ;;  %2041 = vmatprep.subr.bf16.mxu0 %v3345_v50 }
 0x2d9   :  { %1986 = vmatmul.mubr.bf16.vlgmr.msra.gmra.mxu0 %v3982_v25  ;;  %2004 = vmatpush1.bf16.msra.mxu1 %v4049_v6 }
 0x2da   :  { %2042 = vmatpush1.bf16.msra.mxu0 %v4024_v49  ;;  %2365 = vmatprep.mubr.msk.bf16.mxu0 %vm296_vm3, %v3719_v46  ;;  %v1378_v46 = vmax.f32 %v1336_v14, %v4255_v19  ;;  %v2108_v14 = vld [vmem:[#allocation10 + $0x88] sm:$0xff]  ;;  %v2091_v19 = vld [vmem:[#allocation10] sm:$0xff] }
 0x2db   :  { %2005 = vmatprep.subr.bf16.mxu1 %v3345_v50  ;;  %2043 = vmatprep.subr.bf16.mxu0 %v3345_v50 }
 0x2dc   :  { %v1420_v25 = vmax.f32 %v1378_v46, %v1414_v24  ;;  %v2134_v46 = vld [vmem:[#allocation10 + $0x158] sm:$0xff] }
 0x2dd   :  { %2006 = vmatpush1.bf16.msra.mxu1 %v4055_v56 }
 0x2de   :  { %2044 = vmatpush1.bf16.msra.mxu0 %v4035_v58  ;;  %2007 = vmatprep.subr.bf16.mxu1 %v3345_v50  ;;  %v1461_v49 = vmax.f32 %v1420_v25, %v1455_v28  ;;  %v2343_v58 = vld [vmem:[%s4393_s4 + $0x1] ss:$0 sm:$0xff] }
 0x2df   :  { %2045 = vmatprep.subr.bf16.mxu0 %v3345_v50 }
 0x2e0   :  { %v1469_v23 = vadd.f32 %v2343_v58, %v1461_v49  ;;  %v2133_v49 = vld [vmem:[#allocation10 + $0x150] sm:$0xff]  ;;  %v2132_v58 = vld [vmem:[#allocation10 + $0x148] sm:$0xff] }
 0x2e1   :  { %2008 = vmatpush1.bf16.msra.mxu1 %v4063_v4 }
 0x2e2   :  { %2046 = vmatpush1.bf16.msra.mxu0 %v4043_v62  ;;  %2009 = vmatprep.subr.bf16.mxu1 %v3345_v50  ;;  %v1470_v38 = vmax.f32 %v1469_v23, 0.0  ;;  %v2129_v23 = vld [vmem:[#allocation10 + $0x130] sm:$0xff] }
 0x2e3   :  { %2047 = vmatprep.subr.bf16.mxu0 %v3345_v50 }
 0x2e5   :  { %2010 = vmatpush1.bf16.msra.mxu1 %v4069_v59 }
 0x2e6   :  { %2048 = vmatpush1.bf16.msra.mxu0 %v4049_v6  ;;  %2011 = vmatprep.subr.bf16.mxu1 %v3345_v50 }
 0x2e7   :  { %2049 = vmatprep.subr.bf16.mxu0 %v3345_v50 }
 0x2e9   :  { %2012 = vmatpush1.bf16.msra.mxu1 %v4075_v7 }
 0x2ea   :  { %2050 = vmatpush1.bf16.msra.mxu0 %v4055_v56  ;;  %2025 = vmatprep.subr.bf16.mxu1 %v3345_v50  ;;  %v2122_v56 = vld [vmem:[#allocation10 + $0xf8] sm:$0xff] }
 0x2eb   :  { %2051 = vmatprep.subr.bf16.mxu0 %v3345_v50 }
 0x2ec   :  { %v4333_v62 = vpop.f32.mrf.mxu1 }
 0x2ed   :  { %2026 = vmatpush2.bf16.msra.mxu1 %v4081_v8 }
 0x2ee   :  { %2052 = vmatpush1.bf16.msra.mxu0 %v4063_v4  ;;  %2027 = vmatprep.subr.bf16.mxu1 %v3345_v50  ;;  %v1592_v6 = vpop.f32.mrf.mxu1  ;;  %v2105_v4 = vld [vmem:[#allocation10 + $0x70] sm:$0xff] }
 0x2ef   :  { %2053 = vmatprep.subr.bf16.mxu0 %v3345_v50  ;;  %v2130_v6 = vld [vmem:[#allocation10 + $0x138] sm:$0xff] }
 0x2f0   :  { %v1593_v10 = vpop.f32.mrf.mxu1 }
 0x2f1   :  { %2028 = vmatpush2.bf16.msra.mxu1 %v4087_v20 }
 0x2f2   :  { %2054 = vmatpush1.bf16.msra.mxu0 %v4069_v59  ;;  %2583 = vmatprep.subr.mxu1 %v2122_v56  ;;  %v1594_v35 = vpop.f32.mrf.mxu1  ;;  %v2119_v59 = vld [vmem:[#allocation10 + $0xe0] sm:$0xff]  ;;  %v2128_v56 = vld [vmem:[#allocation10 + $0x128] sm:$0xff] }
 0x2f3   :  { %2055 = vmatprep.subr.bf16.mxu0 %v3345_v50 }
 0x2f4   :  { %2030 = vmatmul.mubr.bf16.vlgmr.msra.gmra.mxu1 %v3694_v41 }
 0x2f5   :  { %2584 = vmatpush3.msra.mxu1 %v2106_v32  ;;  %2210 = vmatprep.mubr.f32.mxu1 %v1470_v38  ;;  %v2127_v32 = vld [vmem:[#allocation10 + $0x120] sm:$0xff] }
 0x2f6   :  { %2056 = vmatpush1.bf16.msra.mxu0 %v4075_v7  ;;  %2585 = vmatprep.subr.mxu1 %v2121_v39 }
 0x2f7   :  { %2586 = vmatpush3.msra.mxu1 %v2105_v4  ;;  %2069 = vmatprep.subr.bf16.mxu0 %v3345_v50  ;;  %v2126_v4 = vld [vmem:[#allocation10 + $0x118] sm:$0xff] }
 0x2f8   :  { %2587 = vmatprep.subr.mxu1 %v2120_v42 }
 0x2f9   :  { %v4345_v27 = vpop.f32.mrf.mxu0  ;;  %2588 = vmatpush3.msra.mxu1 %v2104_v44  ;;  %v2125_v44 = vld [vmem:[#allocation10 + $0x110] sm:$0xff] }
 0x2fa   :  { %v1639_v41 = vmax.f32 %v4333_v62, %v4345_v27  ;;  %2070 = vmatpush2.bf16.msra.mxu0 %v4081_v8  ;;  %2589 = vmatprep.subr.mxu1 %v2119_v59  ;;  %v2099_v8 = vld [vmem:[#allocation10 + $0x40] sm:$0xff]  ;;  %v2124_v59 = vld [vmem:[#allocation10 + $0x108] sm:$0xff] }
 0x2fb   :  { %v1635_v7 = vpop.f32.mrf.mxu0  ;;  %2590 = vmatpush3.msra.mxu1 %v2103_v13  ;;  %2071 = vmatprep.subr.bf16.mxu0 %v3345_v50  ;;  %v2114_v50 = vld [vmem:[#allocation10 + $0xb8] sm:$0xff]  ;;  %v2131_v62 = vld [vmem:[#allocation10 + $0x140] sm:$0xff] }
 0x2fc   :  { %2591 = vmatprep.subr.mxu1 %v2118_v30  ;;  %v2123_v13 = vld [vmem:[#allocation10 + $0x100] sm:$0xff] }
 0x2fd   :  { %v1636_v54 = vpop.f32.mrf.mxu0  ;;  %2592 = vmatpush3.msra.mxu1 %v2102_v45 }
 0x2fe   :  { %2072 = vmatpush2.bf16.msra.mxu0 %v4087_v20  ;;  %2593 = vmatprep.subr.mxu1 %v2117_v29  ;;  %v2113_v20 = vld [vmem:[#allocation10 + $0xb0] sm:$0xff] }
 0x2ff   :  { %v1637_v63 = vpop.f32.mrf.mxu0  ;;  %2594 = vmatpush3.msra.mxu1 %v2101_v47  ;;  %3119 = vmatprep.subr.mxu0 %v3341_v0 }
 0x300   :  { %2595 = vmatprep.subr.mxu1 %v2116_v53 }
 0x301   :  { %2074 = vmatmul.mubr.bf16.vlgmr.msra.gmra.mxu0 %v3725_v48  ;;  %2596 = vmatpush3.msra.mxu1 %v2100_v61  ;;  %v2110_v48 = vld [vmem:[#allocation10 + $0x98] sm:$0xff] }
 0x302   :  { %2597 = vmatprep.subr.mxu1 %v2115_v9  ;;  %3151 = vmatprep.mubr.msk.f32.mxu0 %vm3342_vm0, %v3341_v0 }
 0x303   :  { %2598 = vmatpush3.msra.mxu1 %v2099_v8  ;;  %3120 = vmatpush3.msra.mxu0 %v2138_v51 }
 0x304   :  { %2599 = vmatprep.subr.mxu1 %v2114_v50  ;;  %3121 = vmatprep.subr.mxu0 %v3341_v0 }
 0x305   :  { %2600 = vmatpush3.msra.mxu1 %v2098_v55  ;;  %3122 = vmatpush3.msra.mxu0 %v2137_v52 }
 0x306   :  { %2601 = vmatprep.subr.mxu1 %v2113_v20  ;;  %3123 = vmatprep.subr.mxu0 %v3341_v0 }
 0x307   :  { %2602 = vmatpush3.msra.mxu1 %v2097_v1  ;;  %3124 = vmatpush3.msra.mxu0 %v2136_v26  ;;  %v2367_v26 = vld [vmem:[%s4395_s6] ss:$0 sm:$0xff] }
 0x308   :  { %2603 = vmatprep.subr.mxu1 %v2112_v33  ;;  %3125 = vmatprep.subr.mxu0 %v3341_v0 }
 0x309   :  { %2604 = vmatpush3.msra.mxu1 %v2096_v2  ;;  %3126 = vmatpush3.msra.mxu0 %v2135_v18 }
 0x30a   :  { %2605 = vmatprep.subr.mxu1 %v2111_v31  ;;  %3127 = vmatprep.subr.mxu0 %v3341_v0 }
 0x30b   :  { %2606 = vmatpush3.msra.mxu1 %v2095_v57  ;;  %3128 = vmatpush3.msra.mxu0 %v2134_v46 }
 0x30c   :  { %2607 = vmatprep.subr.mxu1 %v2110_v48  ;;  %3129 = vmatprep.subr.mxu0 %v3341_v0 }
 0x30d   :  { %2608 = vmatpush3.msra.mxu1 %v2094_v36  ;;  %3130 = vmatpush3.msra.mxu0 %v2133_v49 }
 0x30e   :  { %2609 = vmatprep.subr.mxu1 %v2109_v11  ;;  %3131 = vmatprep.subr.mxu0 %v3341_v0 }
 0x30f   :  { %2610 = vmatpush3.msra.mxu1 %v2093_v12  ;;  %3132 = vmatpush3.msra.mxu0 %v2132_v58 }
 0x310   :  { %2611 = vmatprep.subr.mxu1 %v2108_v14  ;;  %3133 = vmatprep.subr.mxu0 %v3341_v0 }
 0x311   :  { %2612 = vmatpush3.msra.mxu1 %v2092_v16  ;;  %3134 = vmatpush3.msra.mxu0 %v2131_v62 }
 0x312   :  { %2613 = vmatprep.subr.mxu1 %v2107_v34  ;;  %3135 = vmatprep.subr.mxu0 %v3341_v0 }
 0x313   :  { %2614 = vmatpush3.msra.mxu1 %v2091_v19  ;;  %3136 = vmatpush3.msra.mxu0 %v2130_v6  ;;  %v2366_v19 = vld [vmem:[%s4393_s4 + $0x2] ss:$0 sm:$0xff]  ;;  %s3304_s4 = scalar_lea.vmem %s2294_s13, 128 }
 0x314   :  { %v1677_v21 = vpop.f32.mrf.mxu1  ;;  %2211 = vmatmul.mubr.f32.vlgmr.msra.gmra.mxu1 %v840_v17  ;;  %3137 = vmatprep.subr.mxu0 %v3341_v0  ;;  %p3305_p11 = scmp.ne.s32.totalorder %s2294_s13, %s3304_s4  ;;  %p3310_p13 = scmp.lt.s32.totalorder %s3304_s4, %s3304_s4 }
 0x315   :  { %v1683_v37 = vmax.f32 %v1639_v41, %v1677_v21  ;;  %3138 = vmatpush3.msra.mxu0 %v2129_v23 }
 0x316   :  { %v1679_v24 = vpop.f32.mrf.mxu1  ;;  %3139 = vmatprep.subr.mxu0 %v3341_v0  ;;  %p3311_p0 = por %p3310_p13, %p3309_p12 }
 0x317   :  { %3140 = vmatpush3.msra.mxu0 %v2128_v56 }
 0x318   :  { %v1680_v3 = vpop.f32.mrf.mxu1  ;;  %3141 = vmatprep.subr.mxu0 %v3341_v0  ;;  %p3312_p1 = pnand %p3311_p0, %p3305_p11 }
 0x319   :  { %3142 = vmatpush3.msra.mxu0 %v2127_v32 }
 0x31a   :  { %v1681_v43 = vpop.f32.mrf.mxu1  ;;  %3143 = vmatprep.subr.mxu0 %v3341_v0 }
 0x31b   :  { %3144 = vmatpush3.msra.mxu0 %v2126_v4 }
 0x31c   :  { %3145 = vmatprep.subr.mxu0 %v3341_v0 }
 0x31d   :  { %3146 = vmatpush3.msra.mxu0 %v2125_v44 }
 0x31e   :  { %3147 = vmatprep.subr.mxu0 %v3341_v0 }
 0x31f   :  { %3148 = vmatpush3.msra.mxu0 %v2124_v59 }
 0x320   :  { %3149 = vmatprep.subr.mxu0 %v3341_v0 }
 0x321   :  { %v1721_v22 = vpop.f32.mrf.mxu0  ;;  %3150 = vmatpush3.msra.mxu0 %v2123_v13 }
 0x322   :  { %v1727_v28 = vmax.f32 %v1683_v37, %v1721_v22 }
 0x323   :  { %v1723_v60 = vpop.f32.mrf.mxu0 }
 0x325   :  { %v1724_v40 = vpop.f32.mrf.mxu0 }
 0x327   :  { %v1725_v25 = vpop.f32.mrf.mxu0 }
 0x33c   :  { %v1766_v10 = vpop.f32.mrf.mxu1 }
 0x33d   :  { %v1772_v35 = vmax.f32 %v1727_v28, %v1766_v10 }
 0x33e   :  { %v1768_v38 = vpop.f32.mrf.mxu1 }
 0x340   :  { %v1769_v39 = vpop.f32.mrf.mxu1 }
 0x342   :  { %v1770_v42 = vpop.f32.mrf.mxu1 }
 0x349   :  { %v1810_v27 = vpop.f32.mrf.mxu0 }
 0x34a   :  { %v1816_v30 = vmax.f32 %v1772_v35, %v1810_v27 }
 0x34b   :  { %v1812_v41 = vpop.f32.mrf.mxu0 }
 0x34d   :  { %v1813_v45 = vpop.f32.mrf.mxu0 }
 0x34f   :  { %v1814_v7 = vpop.f32.mrf.mxu0 }
 0x364   :  { %v1854_v29 = vpop.f32.mrf.mxu1 }
 0x365   :  { %v1860_v47 = vmax.f32 %v1816_v30, %v1854_v29 }
 0x366   :  { %v1856_v54 = vpop.f32.mrf.mxu1 }
 0x368   :  { %v1857_v53 = vpop.f32.mrf.mxu1 }
 0x36a   :  { %v1858_v61 = vpop.f32.mrf.mxu1 }
 0x371   :  { %v1898_v63 = vpop.f32.mrf.mxu0 }
 0x372   :  { %v1904_v9 = vmax.f32 %v1860_v47, %v1898_v63 }
 0x373   :  { %v1900_v8 = vpop.f32.mrf.mxu0 }
 0x375   :  { %v1901_v50 = vpop.f32.mrf.mxu0 }
 0x377   :  { %v1902_v55 = vpop.f32.mrf.mxu0 }
 0x38c   :  { %v1943_v20 = vpop.f32.mrf.mxu1 }
 0x38d   :  { %v1949_v14 = vmax.f32 %v1904_v9, %v1943_v20 }
 0x38e   :  { %v1945_v1 = vpop.f32.mrf.mxu1 }
 0x390   :  { %v1946_v0 = vpop.f32.mrf.mxu1 }
 0x392   :  { %v1947_v33 = vpop.f32.mrf.mxu1 }
 0x399   :  { %v1987_v2 = vpop.f32.mrf.mxu0 }
 0x39a   :  { %v1993_v15 = vmax.f32 %v1949_v14, %v1987_v2 }
 0x39b   :  { %v1989_v31 = vpop.f32.mrf.mxu0 }
 0x39d   :  { %v1990_v57 = vpop.f32.mrf.mxu0 }
 0x39f   :  { %v1991_v48 = vpop.f32.mrf.mxu0 }
 0x3b4   :  { %v2031_v36 = vpop.f32.mrf.mxu1 }
 0x3b5   :  { %v2037_v16 = vmax.f32 %v1993_v15, %v2031_v36 }
 0x3b6   :  { %v2033_v5 = vpop.f32.mrf.mxu1 }
 0x3b8   :  { %v2034_v11 = vpop.f32.mrf.mxu1 }
 0x3ba   :  { %v2035_v12 = vpop.f32.mrf.mxu1 }
 0x3c1   :  { %v2075_v34 = vpop.f32.mrf.mxu0 }
 0x3c2   :  { %v2081_v17 = vmax.f32 %v2037_v16, %v2075_v34 }
 0x3c3   :  { %v2077_v21 = vpop.f32.mrf.mxu0 }
 0x3c4   :  { %v2089_v37 = vadd.f32 %v2366_v19, %v2081_v17 }
 0x3c5   :  { %v2078_v24 = vpop.f32.mrf.mxu0 }
 0x3c6   :  { %v2090_v3 = vmax.f32 %v2089_v37, 0.0 }
 0x3c7   :  { %v2079_v43 = vpop.f32.mrf.mxu0 }
 0x3c8   :  { %3152 = vmatmul.mubr.f32.vlgmr.msra.gmra.mxu0 %v2090_v3 }
 0x3d4   :  { %v2615_v51 = vpop.f32.mrf.mxu1 }
 0x3d6   :  { %v2616_v52 = vpop.f32.mrf.mxu1 }
 0x3d7   :  { %v2617_v22 = vadd.f32 %v2616_v52, %v2615_v51 }
 0x3d9   :  { %v2213_v28 = vadd.f32 %v2617_v22, %v2367_v26 }
 0x488   :  { %v2282_v60 = vpop.f32.mrf.mxu0 }
 0x489   :  { %v2283_v18 = vadd.f32 %v2282_v60, %v2213_v28 }
 0x48a   :  { %v3153_v40 = vpop.f32.mrf.mxu0 }
 0x48b   :  { %2286 = vst [vmem:[#allocation11] sm:$0xff] %v2283_v18 }
 0x48c   :  { %3315 = shalt.err (!%p3312_p1)
}
 0x48d   :  { %2296 = dma.vmem_to_hbm [thread:$0]  %s2294_s13, 128, %s4396_s7, [#allocation4]  }
 0x48e   :  { %3330 = dma.done.wait [#allocation4], 128  }
 0x48f   :  { %3331 = vsyncadd [#allocation4], 4294967168 }
 0x490   :  { %2300 = vsyncpa [#allocation3], 1 }
 0x491   :  { %2301 = vsyncpa [#allocation6], 1 }
 0x492   :  { %2302 = vsyncpa [#allocation9], 1 }
 0x493   :  { %2303 = vsyncpa [#allocation4], 1 }

</bundles_post_ra>
